<compile_context>
chip_gen: v7x
topology: tpu7x:2x2x1
jax: 0.10.0
libtpu: 0.0.40
codegen_flags: <defaults>
</compile_context>

<pallas_src>
import math
import functools

import jax
import jax.numpy as jnp
import numpy as np
from jax import lax
from jax.experimental import pallas as pl
from jax.experimental.pallas import tpu as pltpu

# ---------------- small config (consistent with the module's structure) --------
BATCH = 2
SEQ = 16
HIDDEN = 128
NUM_HEADS = 4
NUM_KV_HEADS = 2
HEAD_DIM = HIDDEN // NUM_HEADS          # 32
KV_GROUPS = NUM_HEADS // NUM_KV_HEADS   # 2
INTERMEDIATE = 256
ROPE_THETA = 10000.0
EPS = 1e-6

QW = NUM_HEADS * HEAD_DIM               # 128 (q lanes)
KW = NUM_KV_HEADS * HEAD_DIM            # 64  (k lanes)
QKW = QW + KW                           # 192 (fused q||k width)
QKVW = QW + 2 * KW                      # 256 (fused q||k||v width)


def _rms_rows(x, w):
    # x: (rows, D) f32, w: (1, D) f32
    var = jnp.mean(x * x, axis=-1, keepdims=True)
    return w * (x * lax.rsqrt(var + EPS))


def decoder_layer_kernel(
    nb,           # static python int: batch rows per grid step
    x_ref,        # (nb, S, H) f32
    cos_ref,      # (S, QKW) f32   cos tiled per head; q lanes carry 1/sqrt(hd)
    sin_ref,      # (S, QKW) f32
    rope_ref,     # (QKW, QKW) bf16 signed rotate_half permutation (per head)
    hsum_ref,     # (QKW, QKW) bf16 block-diagonal ones (per-head sum + bcast)
    ln1_ref,      # (1, H) f32
    wqkv_ref,     # (H, QKVW) bf16  wq || wk || wv
    qkn_ref,      # (1, QKW) f32    q_norm weight x NH || k_norm weight x NKV
    wo_ref,       # (H, H) bf16
    ln2_ref,      # (1, H) f32
    wgu_ref,      # (H, 2I) bf16    wg || wu
    wd_ref,       # (I, H) bf16
    out_ref,      # (nb, S, H) f32
):
    S, H, hd = SEQ, HIDDEN, HEAD_DIM
    rows = nb * S

    x = x_ref[...].reshape(rows, H)                 # residual, f32

    # ---- input RMSNorm ----
    h_b = _rms_rows(x, ln1_ref[...]).astype(jnp.bfloat16)

    # ---- fused QKV projection: ONE MXU push, N = 256 ----
    qkv = jnp.dot(h_b, wqkv_ref[...], preferred_element_type=jnp.float32)   # (rows, 256)
    qk = qkv[:, :QKW]                                # (rows, 192) q||k
    v_b = qkv[:, QKW:].astype(jnp.bfloat16)          # (rows, 64)

    # ---- per-head RMSNorm (q_norm / k_norm) on the fused q||k slab ----
    # block-diag ones matmul (bf16) gives per-head sum of squares broadcast back.
    sq = (qk * qk).astype(jnp.bfloat16)
    ms = jnp.dot(sq, hsum_ref[...], preferred_element_type=jnp.float32) * (1.0 / hd)
    qk = qkn_ref[...] * (qk * lax.rsqrt(ms + EPS))

    # ---- RoPE on the fused slab: rotate_half == signed permutation matmul ----
    qk_rot = jnp.dot(qk.astype(jnp.bfloat16), rope_ref[...],
                     preferred_element_type=jnp.float32)
    cos, sin = cos_ref[...], sin_ref[...]
    if nb > 1:                                       # repeat tables per sequence
        cos = jnp.concatenate([cos] * nb, axis=0)
        sin = jnp.concatenate([sin] * nb, axis=0)
    qk = qk * cos + qk_rot * sin                     # 1/sqrt(hd) folded into q cos/sin
    qk_b = qk.astype(jnp.bfloat16)

    # causal additive mask (finite, safe with max-subtraction), stacked for the
    # paired-head (sublane-stacked) scores
    row_i = lax.broadcasted_iota(jnp.int32, (S, S), 0)
    col_i = lax.broadcasted_iota(jnp.int32, (S, S), 1)
    mask1 = jnp.where(col_i > row_i, jnp.float32(-1e30), jnp.float32(0.0))
    mask_stack = jnp.concatenate([mask1] * KV_GROUPS, axis=0)   # (G*S, S)

    # ---- attention per sequence / kv head (q heads paired), split-K o_proj ----
    h1_parts = []
    for b in range(nb):
        r0 = b * S
        attn_acc = jnp.zeros((S, H), jnp.float32)
        for g in range(NUM_KV_HEADS):
            q0 = (g * KV_GROUPS) * hd
            # stack the KV_GROUPS query heads sharing kv head g along sublanes
            q_stack = jnp.concatenate(
                [qk_b[r0:r0 + S, q0 + j * hd:q0 + (j + 1) * hd]
                 for j in range(KV_GROUPS)], axis=0)              # (G*S, hd)
            kh = qk_b[r0:r0 + S, QW + g * hd:QW + (g + 1) * hd]   # (S, hd)
            vh = v_b[r0:r0 + S, g * hd:(g + 1) * hd]              # (S, hd)

            scores = lax.dot_general(
                q_stack, kh, (((1,), (1,)), ((), ())),
                preferred_element_type=jnp.float32) + mask_stack  # (G*S, S)

            m = jnp.max(scores, axis=-1, keepdims=True)
            p = jnp.exp(scores - m)
            p = p * pl.reciprocal(jnp.sum(p, axis=-1, keepdims=True), approx=True)

            ctx = jnp.dot(p.astype(jnp.bfloat16), vh,
                          preferred_element_type=jnp.float32)     # (G*S, hd)
            # re-pack to (S, G*hd) lanes so one split-K o_proj matmul covers
            # both heads of the group; slice wo from the VMEM ref (no hoist).
            ctx_cat = jnp.concatenate(
                [ctx[j * S:(j + 1) * S, :] for j in range(KV_GROUPS)], axis=1)
            wo_g = wo_ref[q0:q0 + KV_GROUPS * hd, :]              # (G*hd, H) bf16
            attn_acc = attn_acc + jnp.dot(
                ctx_cat.astype(jnp.bfloat16), wo_g,
                preferred_element_type=jnp.float32)               # (S, H) lane-dense
        h1_parts.append(x[r0:r0 + S, :] + attn_acc)
    h1 = h1_parts[0] if nb == 1 else jnp.concatenate(h1_parts, axis=0)

    # ---- post-attention RMSNorm + SwiGLU MLP (fused gate/up matmul) ----
    h2_b = _rms_rows(h1, ln2_ref[...]).astype(jnp.bfloat16)
    gu = jnp.dot(h2_b, wgu_ref[...], preferred_element_type=jnp.float32)    # (rows, 2I)
    gate = gu[:, :INTERMEDIATE]
    up = gu[:, INTERMEDIATE:]
    act = (gate * jax.nn.sigmoid(gate)) * up                                # SiLU(gate)*up
    mlp = jnp.dot(act.astype(jnp.bfloat16), wd_ref[...],
                  preferred_element_type=jnp.float32)                       # (rows, H)

    out_ref[...] = (h1 + mlp).reshape(nb, S, H)


# ---------------- host-side constant tables (built once per layer) --------------
def _rope_tables(seq, hd, theta):
    inv_freq = 1.0 / (theta ** (np.arange(0, hd, 2, dtype=np.float32) / hd))
    pos = np.arange(seq, dtype=np.float32)
    freqs = np.einsum("i,j->ij", pos, inv_freq)
    emb = np.concatenate([freqs, freqs], axis=-1)          # (S, hd)
    return np.cos(emb).astype(np.float32), np.sin(emb).astype(np.float32)


def _rotate_half_matrix(num_heads, hd):
    """Signed permutation P such that (t @ P) == rotate_half(t) within each head."""
    w = num_heads * hd
    i = np.arange(w)[:, None]        # input lane
    j = np.arange(w)[None, :]        # output lane
    same_head = (i // hd) == (j // hd)
    first_half = (j % hd) < hd // 2
    neg = same_head & first_half & (i == j + hd // 2)      # out[j] = -t[j + hd/2]
    pos = same_head & (~first_half) & (i == j - hd // 2)   # out[j] = +t[j - hd/2]
    return (pos.astype(np.float32) - neg.astype(np.float32))


def _head_sum_matrix(num_heads, hd):
    """Block-diagonal ones: (t*t) @ M gives per-head sums broadcast back per lane."""
    w = num_heads * hd
    i = np.arange(w)[:, None]
    j = np.arange(w)[None, :]
    return ((i // hd) == (j // hd)).astype(np.float32)


# ---------------- builder: hoists all per-call host work, returns jitted fn -----
def make_qwen3_decoder_layer(params, *, batch=BATCH, seq=SEQ, batch_block=None):
    """Returns a jitted `x -> out` forward fn with all tables / bf16 weights
    prebuilt.  batch_block=None (default) folds the whole batch into one grid
    step (best on single-TC v5e/v6e); batch_block=1 keeps grid=(B,) "parallel"
    for dual-TC v7x megacore sharding."""
    nb = batch if batch_block is None else batch_block
    assert batch % nb == 0
    S, H, hd = seq, HIDDEN, HEAD_DIM
    n_total_heads = NUM_HEADS + NUM_KV_HEADS
    scale = 1.0 / math.sqrt(hd)

    cos, sin = _rope_tables(S, hd, ROPE_THETA)
    # fold the 1/sqrt(head_dim) attention scale into the q lanes of cos/sin
    lane_scale = np.concatenate([np.full((1, QW), scale, np.float32),
                                 np.ones((1, KW), np.float32)], axis=1)
    cos_qk = jnp.asarray(np.tile(cos, (1, n_total_heads)) * lane_scale)
    sin_qk = jnp.asarray(np.tile(sin, (1, n_total_heads)) * lane_scale)
    rope_qk = jnp.asarray(_rotate_half_matrix(n_total_heads, hd), dtype=jnp.bfloat16)
    hsum_qk = jnp.asarray(_head_sum_matrix(n_total_heads, hd), dtype=jnp.bfloat16)

    bf = lambda w: jnp.asarray(w, dtype=jnp.bfloat16)
    ln1 = jnp.asarray(params["ln1"], jnp.float32).reshape(1, H)
    ln2 = jnp.asarray(params["ln2"], jnp.float32).reshape(1, H)
    qn = jnp.tile(jnp.asarray(params["qn"], jnp.float32).reshape(1, hd), (1, NUM_HEADS))
    kn = jnp.tile(jnp.asarray(params["kn"], jnp.float32).reshape(1, hd), (1, NUM_KV_HEADS))
    qkn = jnp.concatenate([qn, kn], axis=1)                       # (1, QKW)
    wqkv = bf(jnp.concatenate([params["wq"], params["wk"], params["wv"]], axis=1))
    wo = bf(params["wo"])
    wgu = bf(jnp.concatenate([params["wg"], params["wu"]], axis=1))
    wd = bf(params["wd"])

    consts = (cos_qk, sin_qk, rope_qk, hsum_qk, ln1, wqkv, qkn, wo, ln2, wgu, wd)

    def full_spec(a):
        nd = a.ndim
        return pl.BlockSpec(a.shape, lambda b, _nd=nd: (0,) * _nd)

    in_specs = [pl.BlockSpec((nb, S, H), lambda b: (b, 0, 0))]
    in_specs += [full_spec(a) for a in consts]

    call = pl.pallas_call(
        functools.partial(decoder_layer_kernel, nb),
        out_shape=jax.ShapeDtypeStruct((batch, S, H), jnp.float32),
        grid_spec=pltpu.PrefetchScalarGridSpec(
            num_scalar_prefetch=0,
            grid=(batch // nb,),
            in_specs=in_specs,
            out_specs=pl.BlockSpec((nb, S, H), lambda b: (b, 0, 0)),
        ),
        compiler_params=pltpu.CompilerParams(
            dimension_semantics=("parallel",) if nb == 1 else ("arbitrary",)),
    )

    @jax.jit
    def forward(x):
        return call(x, *consts)

    return forward


# ---------------- pure-JAX reference (mirrors the PyTorch forward, eval mode) ----
def reference(x, p):
    hd = HEAD_DIM
    B, S, H = x.shape

    def rms(v, w):
        var = jnp.mean(v * v, axis=-1, keepdims=True)
        return w * (v * lax.rsqrt(var + EPS))

    cos_np, sin_np = _rope_tables(S, hd, ROPE_THETA)
    cos, sin = jnp.asarray(cos_np), jnp.asarray(sin_np)

    h = rms(x, p["ln1"])
    q = h @ p["wq"]
    k = h @ p["wk"]
    v = h @ p["wv"]
    q = q.reshape(B, S, NUM_HEADS, hd).transpose(0, 2, 1, 3)
    k = k.reshape(B, S, NUM_KV_HEADS, hd).transpose(0, 2, 1, 3)
    v = v.reshape(B, S, NUM_KV_HEADS, hd).transpose(0, 2, 1, 3)
    q = rms(q, p["qn"])
    k = rms(k, p["kn"])

    def rot_half(t):
        t1, t2 = t[..., :hd // 2], t[..., hd // 2:]
        return jnp.concatenate([-t2, t1], axis=-1)

    c, s = cos[None, None], sin[None, None]
    q = q * c + rot_half(q) * s
    k = k * c + rot_half(k) * s
    k = jnp.repeat(k, KV_GROUPS, axis=1)
    v = jnp.repeat(v, KV_GROUPS, axis=1)
    scores = jnp.einsum("bhqd,bhkd->bhqk", q, k) / math.sqrt(hd)
    mask = jnp.triu(jnp.ones((S, S)), k=1)
    scores = scores + jnp.where(mask == 1, -jnp.inf, 0.0)[None, None]
    attn = jax.nn.softmax(scores, axis=-1)
    ctx = jnp.einsum("bhqk,bhkd->bhqd", attn, v)
    ctx = ctx.transpose(0, 2, 1, 3).reshape(B, S, H)
    h1 = x + ctx @ p["wo"]
    h2 = rms(h1, p["ln2"])
    gate = h2 @ p["wg"]
    up = h2 @ p["wu"]
    return h1 + (gate * jax.nn.sigmoid(gate) * up) @ p["wd"]


if __name__ == "__main__":
    key = jax.random.PRNGKey(0)
    keys = jax.random.split(key, 12)

    def w(k_, shape, scale=0.02):
        return (scale * jax.random.normal(k_, shape)).astype(jnp.float32)

    params = {
        "ln1": (1.0 + 0.1 * jax.random.normal(keys[8], (HIDDEN,))).astype(jnp.float32),
        "ln2": (1.0 + 0.1 * jax.random.normal(keys[9], (HIDDEN,))).astype(jnp.float32),
        "qn": (1.0 + 0.1 * jax.random.normal(keys[10], (HEAD_DIM,))).astype(jnp.float32),
        "kn": (1.0 + 0.1 * jax.random.normal(keys[11], (HEAD_DIM,))).astype(jnp.float32),
        "wq": w(keys[0], (HIDDEN, NUM_HEADS * HEAD_DIM)),
        "wk": w(keys[1], (HIDDEN, NUM_KV_HEADS * HEAD_DIM)),
        "wv": w(keys[2], (HIDDEN, NUM_KV_HEADS * HEAD_DIM)),
        "wo": w(keys[3], (HIDDEN, HIDDEN)),
        "wg": w(keys[4], (HIDDEN, INTERMEDIATE)),
        "wu": w(keys[5], (HIDDEN, INTERMEDIATE)),
        "wd": w(keys[6], (INTERMEDIATE, HIDDEN)),
    }
    x = jax.random.normal(keys[7], (BATCH, SEQ, HIDDEN), jnp.float32)

    ref = reference(x, params)

    # Tolerance is bf16-level: all matmul inputs (weights, activations, and the
    # exact +-1/0 rope/head-sum tables' operands) are bf16 with f32 accumulation.
    layer = make_qwen3_decoder_layer(params)                 # folded batch, grid=(1,)
    out = jax.block_until_ready(layer(x))
    np.testing.assert_allclose(np.asarray(out), np.asarray(ref), rtol=2e-2, atol=2e-2)

    # grid=(B,) "parallel" variant (one batch row per TensorCore on v7x).
    layer_par = make_qwen3_decoder_layer(params, batch_block=1)
    out2 = jax.block_until_ready(layer_par(x))
    np.testing.assert_allclose(np.asarray(out2), np.asarray(ref), rtol=2e-2, atol=2e-2)

    print("KERNEL_OK")
</pallas_src>

<mosaic_0001>
module attributes {stable_mosaic.version = 11 : i64} {
  func.func @decoder_layer_kernel(%arg0: i32, %arg1: memref<2x16x128xf32, #tpu.memory_space<vmem>>, %arg2: memref<16x192xf32, #tpu.memory_space<vmem>>, %arg3: memref<16x192xf32, #tpu.memory_space<vmem>>, %arg4: memref<192x192xbf16, #tpu.memory_space<vmem>>, %arg5: memref<192x192xbf16, #tpu.memory_space<vmem>>, %arg6: memref<1x128xf32, #tpu.memory_space<vmem>>, %arg7: memref<128x256xbf16, #tpu.memory_space<vmem>>, %arg8: memref<1x192xf32, #tpu.memory_space<vmem>>, %arg9: memref<128x128xbf16, #tpu.memory_space<vmem>>, %arg10: memref<1x128xf32, #tpu.memory_space<vmem>>, %arg11: memref<128x512xbf16, #tpu.memory_space<vmem>>, %arg12: memref<256x128xbf16, #tpu.memory_space<vmem>>, %arg13: memref<2x16x128xf32, #tpu.memory_space<vmem>>) attributes {dimension_semantics = [#tpu.dimension_semantics<arbitrary>], iteration_bounds = array<i64: 1>, scalar_prefetch = 0 : i64, scratch_operands = 0 : i64, tpu.core_type = #tpu.core_type<tc>, window_params = [{transform_indices = @transform_0, window_bounds = array<i64: 2, 16, 128>}, {pipeline_mode = #tpu.pipeline_mode<synchronous>, transform_indices = @transform_1, window_bounds = array<i64: 16, 192>}, {pipeline_mode = #tpu.pipeline_mode<synchronous>, transform_indices = @transform_2, window_bounds = array<i64: 16, 192>}, {pipeline_mode = #tpu.pipeline_mode<synchronous>, transform_indices = @transform_3, window_bounds = array<i64: 192, 192>}, {pipeline_mode = #tpu.pipeline_mode<synchronous>, transform_indices = @transform_4, window_bounds = array<i64: 192, 192>}, {pipeline_mode = #tpu.pipeline_mode<synchronous>, transform_indices = @transform_5, window_bounds = array<i64: 1, 128>}, {pipeline_mode = #tpu.pipeline_mode<synchronous>, transform_indices = @transform_6, window_bounds = array<i64: 128, 256>}, {pipeline_mode = #tpu.pipeline_mode<synchronous>, transform_indices = @transform_7, window_bounds = array<i64: 1, 192>}, {pipeline_mode = #tpu.pipeline_mode<synchronous>, transform_indices = @transform_8, window_bounds = array<i64: 128, 128>}, {pipeline_mode = #tpu.pipeline_mode<synchronous>, transform_indices = @transform_9, window_bounds = array<i64: 1, 128>}, {pipeline_mode = #tpu.pipeline_mode<synchronous>, transform_indices = @transform_10, window_bounds = array<i64: 128, 512>}, {pipeline_mode = #tpu.pipeline_mode<synchronous>, transform_indices = @transform_11, window_bounds = array<i64: 256, 128>}, {transform_indices = @transform_12, window_bounds = array<i64: 2, 16, 128>}]} {
    %c0 = arith.constant 0 : index
    %c0_0 = arith.constant 0 : index
    %c0_1 = arith.constant 0 : index
    %0 = vector.load %arg1[%c0, %c0_0, %c0_1] : memref<2x16x128xf32, #tpu.memory_space<vmem>>, vector<2x16x128xf32>
    %1 = vector.shape_cast %0 : vector<2x16x128xf32> to vector<32x128xf32>
    %c0_2 = arith.constant 0 : index
    %c0_3 = arith.constant 0 : index
    %2 = vector.load %arg6[%c0_2, %c0_3] : memref<1x128xf32, #tpu.memory_space<vmem>>, vector<1x128xf32>
    %3 = arith.mulf %1, %1 : vector<32x128xf32>
    %cst = arith.constant dense<0.000000e+00> : vector<32xf32>
    %4 = vector.multi_reduction <add>, %3, %cst [1] : vector<32x128xf32> to vector<32xf32>
    %5 = vector.shape_cast %4 : vector<32xf32> to vector<32x1xf32>
    %cst_4 = arith.constant 1.280000e+02 : f32
    %6 = vector.broadcast %cst_4 : f32 to vector<32x1xf32>
    %7 = arith.divf %5, %6 : vector<32x1xf32>
    %cst_5 = arith.constant 9.99999997E-7 : f32
    %8 = vector.broadcast %cst_5 : f32 to vector<32x1xf32>
    %9 = arith.addf %7, %8 : vector<32x1xf32>
    %10 = math.rsqrt %9 : vector<32x1xf32>
    %11 = vector.broadcast %10 : vector<32x1xf32> to vector<32x128xf32>
    %12 = arith.mulf %1, %11 : vector<32x128xf32>
    %13 = vector.broadcast %2 : vector<1x128xf32> to vector<32x128xf32>
    %14 = arith.mulf %13, %12 : vector<32x128xf32>
    %15 = arith.truncf %14 : vector<32x128xf32> to vector<32x128xbf16>
    %c0_6 = arith.constant 0 : index
    %c0_7 = arith.constant 0 : index
    %16 = vector.load %arg7[%c0_6, %c0_7] : memref<128x256xbf16, #tpu.memory_space<vmem>>, vector<128x256xbf16>
    %cst_8 = arith.constant dense<0.000000e+00> : vector<32x256xf32>
    %17 = tpu.matmul %15, %16, %cst_8 {dimension_numbers = #tpu.dot_dimension_numbers<[1], [0], [0], [1], [0, 0, 1, 1], [], []>} : vector<32x128xbf16>, vector<128x256xbf16>, vector<32x256xf32> -> vector<32x256xf32>
    %18 = vector.extract_strided_slice %17 {offsets = [0, 0], sizes = [32, 192], strides = [1, 1]} : vector<32x256xf32> to vector<32x192xf32>
    %19 = vector.extract_strided_slice %17 {offsets = [0, 192], sizes = [32, 64], strides = [1, 1]} : vector<32x256xf32> to vector<32x64xf32>
    %20 = arith.truncf %19 : vector<32x64xf32> to vector<32x64xbf16>
    %21 = arith.mulf %18, %18 : vector<32x192xf32>
    %22 = arith.truncf %21 : vector<32x192xf32> to vector<32x192xbf16>
    %c0_9 = arith.constant 0 : index
    %c0_10 = arith.constant 0 : index
    %23 = vector.load %arg5[%c0_9, %c0_10] : memref<192x192xbf16, #tpu.memory_space<vmem>>, vector<192x192xbf16>
    %cst_11 = arith.constant dense<0.000000e+00> : vector<32x192xf32>
    %24 = tpu.matmul %22, %23, %cst_11 {dimension_numbers = #tpu.dot_dimension_numbers<[1], [0], [0], [1], [0, 0, 1, 1], [], []>} : vector<32x192xbf16>, vector<192x192xbf16>, vector<32x192xf32> -> vector<32x192xf32>
    %cst_12 = arith.constant 3.125000e-02 : f32
    %25 = vector.broadcast %cst_12 : f32 to vector<32x192xf32>
    %26 = arith.mulf %24, %25 : vector<32x192xf32>
    %c0_13 = arith.constant 0 : index
    %c0_14 = arith.constant 0 : index
    %27 = vector.load %arg8[%c0_13, %c0_14] : memref<1x192xf32, #tpu.memory_space<vmem>>, vector<1x192xf32>
    %cst_15 = arith.constant 9.99999997E-7 : f32
    %28 = vector.broadcast %cst_15 : f32 to vector<32x192xf32>
    %29 = arith.addf %26, %28 : vector<32x192xf32>
    %30 = math.rsqrt %29 : vector<32x192xf32>
    %31 = arith.mulf %18, %30 : vector<32x192xf32>
    %32 = vector.broadcast %27 : vector<1x192xf32> to vector<32x192xf32>
    %33 = arith.mulf %32, %31 : vector<32x192xf32>
    %34 = arith.truncf %33 : vector<32x192xf32> to vector<32x192xbf16>
    %c0_16 = arith.constant 0 : index
    %c0_17 = arith.constant 0 : index
    %35 = vector.load %arg4[%c0_16, %c0_17] : memref<192x192xbf16, #tpu.memory_space<vmem>>, vector<192x192xbf16>
    %cst_18 = arith.constant dense<0.000000e+00> : vector<32x192xf32>
    %36 = tpu.matmul %34, %35, %cst_18 {dimension_numbers = #tpu.dot_dimension_numbers<[1], [0], [0], [1], [0, 0, 1, 1], [], []>} : vector<32x192xbf16>, vector<192x192xbf16>, vector<32x192xf32> -> vector<32x192xf32>
    %c0_19 = arith.constant 0 : index
    %c0_20 = arith.constant 0 : index
    %37 = vector.load %arg2[%c0_19, %c0_20] : memref<16x192xf32, #tpu.memory_space<vmem>>, vector<16x192xf32>
    %c0_21 = arith.constant 0 : index
    %c0_22 = arith.constant 0 : index
    %38 = vector.load %arg3[%c0_21, %c0_22] : memref<16x192xf32, #tpu.memory_space<vmem>>, vector<16x192xf32>
    %39 = tpu.concatenate %37, %37 in 0 : vector<16x192xf32>, vector<16x192xf32> -> vector<32x192xf32>
    %40 = tpu.concatenate %38, %38 in 0 : vector<16x192xf32>, vector<16x192xf32> -> vector<32x192xf32>
    %41 = arith.mulf %33, %39 : vector<32x192xf32>
    %42 = arith.mulf %36, %40 : vector<32x192xf32>
    %43 = arith.addf %41, %42 : vector<32x192xf32>
    %44 = arith.truncf %43 : vector<32x192xf32> to vector<32x192xbf16>
    %45 = tpu.iota {dimensions = array<i32: 0>} : vector<16x16xi32>
    %46 = tpu.iota {dimensions = array<i32: 1>} : vector<16x16xi32>
    %47 = arith.cmpi sgt, %46, %45 : vector<16x16xi32>
    %cst_23 = arith.constant -1.000000e+30 : f32
    %cst_24 = arith.constant 0.000000e+00 : f32
    %48 = vector.broadcast %cst_23 : f32 to vector<16x16xf32>
    %49 = vector.broadcast %cst_24 : f32 to vector<16x16xf32>
    %50 = arith.select %47, %48, %49 : vector<16x16xi1>, vector<16x16xf32>
    %51 = tpu.concatenate %50, %50 in 0 : vector<16x16xf32>, vector<16x16xf32> -> vector<32x16xf32>
    %cst_25 = arith.constant 0.000000e+00 : f32
    %52 = vector.broadcast %cst_25 : f32 to vector<16x128xf32>
    %53 = vector.extract_strided_slice %44 {offsets = [0, 0], sizes = [16, 32], strides = [1, 1]} : vector<32x192xbf16> to vector<16x32xbf16>
    %54 = vector.extract_strided_slice %44 {offsets = [0, 32], sizes = [16, 32], strides = [1, 1]} : vector<32x192xbf16> to vector<16x32xbf16>
    %55 = tpu.concatenate %53, %54 in 0 : vector<16x32xbf16>, vector<16x32xbf16> -> vector<32x32xbf16>
    %56 = vector.extract_strided_slice %44 {offsets = [0, 128], sizes = [16, 32], strides = [1, 1]} : vector<32x192xbf16> to vector<16x32xbf16>
    %57 = vector.extract_strided_slice %20 {offsets = [0, 0], sizes = [16, 32], strides = [1, 1]} : vector<32x64xbf16> to vector<16x32xbf16>
    %cst_26 = arith.constant dense<0.000000e+00> : vector<32x16xf32>
    %58 = tpu.matmul %55, %56, %cst_26 {dimension_numbers = #tpu.dot_dimension_numbers<[1], [1], [0], [0], [0, 0, 1, 0], [], []>} : vector<32x32xbf16>, vector<16x32xbf16>, vector<32x16xf32> -> vector<32x16xf32>
    %59 = arith.addf %58, %51 : vector<32x16xf32>
    %cst_27 = arith.constant dense<0xFF800000> : vector<32xf32>
    %60 = vector.multi_reduction <maximumf>, %59, %cst_27 [1] : vector<32x16xf32> to vector<32xf32>
    %61 = vector.shape_cast %60 : vector<32xf32> to vector<32x1xf32>
    %62 = vector.broadcast %61 : vector<32x1xf32> to vector<32x16xf32>
    %63 = arith.subf %59, %62 : vector<32x16xf32>
    %64 = math.exp %63 : vector<32x16xf32>
    %cst_28 = arith.constant dense<0.000000e+00> : vector<32xf32>
    %65 = vector.multi_reduction <add>, %64, %cst_28 [1] : vector<32x16xf32> to vector<32xf32>
    %66 = vector.shape_cast %65 : vector<32xf32> to vector<32x1xf32>
    %67 = tpu.reciprocal %66 {approx = true} : vector<32x1xf32> -> vector<32x1xf32>
    %68 = vector.broadcast %67 : vector<32x1xf32> to vector<32x16xf32>
    %69 = arith.mulf %64, %68 : vector<32x16xf32>
    %70 = arith.truncf %69 : vector<32x16xf32> to vector<32x16xbf16>
    %cst_29 = arith.constant dense<0.000000e+00> : vector<32x32xf32>
    %71 = tpu.matmul %70, %57, %cst_29 {dimension_numbers = #tpu.dot_dimension_numbers<[1], [0], [0], [1], [0, 0, 1, 1], [], []>} : vector<32x16xbf16>, vector<16x32xbf16>, vector<32x32xf32> -> vector<32x32xf32>
    %72 = vector.extract_strided_slice %71 {offsets = [0, 0], sizes = [16, 32], strides = [1, 1]} : vector<32x32xf32> to vector<16x32xf32>
    %73 = vector.extract_strided_slice %71 {offsets = [16, 0], sizes = [16, 32], strides = [1, 1]} : vector<32x32xf32> to vector<16x32xf32>
    %74 = tpu.concatenate %72, %73 in 1 : vector<16x32xf32>, vector<16x32xf32> -> vector<16x64xf32>
    %c0_30 = arith.constant 0 : index
    %c0_31 = arith.constant 0 : index
    %75 = vector.load %arg9[%c0_30, %c0_31] : memref<128x128xbf16, #tpu.memory_space<vmem>>, vector<64x128xbf16>
    %76 = arith.truncf %74 : vector<16x64xf32> to vector<16x64xbf16>
    %cst_32 = arith.constant dense<0.000000e+00> : vector<16x128xf32>
    %77 = tpu.matmul %76, %75, %cst_32 {dimension_numbers = #tpu.dot_dimension_numbers<[1], [0], [0], [1], [0, 0, 1, 1], [], []>} : vector<16x64xbf16>, vector<64x128xbf16>, vector<16x128xf32> -> vector<16x128xf32>
    %78 = arith.addf %52, %77 : vector<16x128xf32>
    %79 = vector.extract_strided_slice %44 {offsets = [0, 64], sizes = [16, 32], strides = [1, 1]} : vector<32x192xbf16> to vector<16x32xbf16>
    %80 = vector.extract_strided_slice %44 {offsets = [0, 96], sizes = [16, 32], strides = [1, 1]} : vector<32x192xbf16> to vector<16x32xbf16>
    %81 = tpu.concatenate %79, %80 in 0 : vector<16x32xbf16>, vector<16x32xbf16> -> vector<32x32xbf16>
    %82 = vector.extract_strided_slice %44 {offsets = [0, 160], sizes = [16, 32], strides = [1, 1]} : vector<32x192xbf16> to vector<16x32xbf16>
    %83 = vector.extract_strided_slice %20 {offsets = [0, 32], sizes = [16, 32], strides = [1, 1]} : vector<32x64xbf16> to vector<16x32xbf16>
    %cst_33 = arith.constant dense<0.000000e+00> : vector<32x16xf32>
    %84 = tpu.matmul %81, %82, %cst_33 {dimension_numbers = #tpu.dot_dimension_numbers<[1], [1], [0], [0], [0, 0, 1, 0], [], []>} : vector<32x32xbf16>, vector<16x32xbf16>, vector<32x16xf32> -> vector<32x16xf32>
    %85 = arith.addf %84, %51 : vector<32x16xf32>
    %cst_34 = arith.constant dense<0xFF800000> : vector<32xf32>
    %86 = vector.multi_reduction <maximumf>, %85, %cst_34 [1] : vector<32x16xf32> to vector<32xf32>
    %87 = vector.shape_cast %86 : vector<32xf32> to vector<32x1xf32>
    %88 = vector.broadcast %87 : vector<32x1xf32> to vector<32x16xf32>
    %89 = arith.subf %85, %88 : vector<32x16xf32>
    %90 = math.exp %89 : vector<32x16xf32>
    %cst_35 = arith.constant dense<0.000000e+00> : vector<32xf32>
    %91 = vector.multi_reduction <add>, %90, %cst_35 [1] : vector<32x16xf32> to vector<32xf32>
    %92 = vector.shape_cast %91 : vector<32xf32> to vector<32x1xf32>
    %93 = tpu.reciprocal %92 {approx = true} : vector<32x1xf32> -> vector<32x1xf32>
    %94 = vector.broadcast %93 : vector<32x1xf32> to vector<32x16xf32>
    %95 = arith.mulf %90, %94 : vector<32x16xf32>
    %96 = arith.truncf %95 : vector<32x16xf32> to vector<32x16xbf16>
    %cst_36 = arith.constant dense<0.000000e+00> : vector<32x32xf32>
    %97 = tpu.matmul %96, %83, %cst_36 {dimension_numbers = #tpu.dot_dimension_numbers<[1], [0], [0], [1], [0, 0, 1, 1], [], []>} : vector<32x16xbf16>, vector<16x32xbf16>, vector<32x32xf32> -> vector<32x32xf32>
    %98 = vector.extract_strided_slice %97 {offsets = [0, 0], sizes = [16, 32], strides = [1, 1]} : vector<32x32xf32> to vector<16x32xf32>
    %99 = vector.extract_strided_slice %97 {offsets = [16, 0], sizes = [16, 32], strides = [1, 1]} : vector<32x32xf32> to vector<16x32xf32>
    %100 = tpu.concatenate %98, %99 in 1 : vector<16x32xf32>, vector<16x32xf32> -> vector<16x64xf32>
    %c64 = arith.constant 64 : index
    %c0_37 = arith.constant 0 : index
    %101 = vector.load %arg9[%c64, %c0_37] : memref<128x128xbf16, #tpu.memory_space<vmem>>, vector<64x128xbf16>
    %102 = arith.truncf %100 : vector<16x64xf32> to vector<16x64xbf16>
    %cst_38 = arith.constant dense<0.000000e+00> : vector<16x128xf32>
    %103 = tpu.matmul %102, %101, %cst_38 {dimension_numbers = #tpu.dot_dimension_numbers<[1], [0], [0], [1], [0, 0, 1, 1], [], []>} : vector<16x64xbf16>, vector<64x128xbf16>, vector<16x128xf32> -> vector<16x128xf32>
    %104 = arith.addf %78, %103 : vector<16x128xf32>
    %105 = vector.extract_strided_slice %1 {offsets = [0, 0], sizes = [16, 128], strides = [1, 1]} : vector<32x128xf32> to vector<16x128xf32>
    %106 = arith.addf %105, %104 : vector<16x128xf32>
    %cst_39 = arith.constant 0.000000e+00 : f32
    %107 = vector.broadcast %cst_39 : f32 to vector<16x128xf32>
    %108 = vector.extract_strided_slice %44 {offsets = [16, 0], sizes = [16, 32], strides = [1, 1]} : vector<32x192xbf16> to vector<16x32xbf16>
    %109 = vector.extract_strided_slice %44 {offsets = [16, 32], sizes = [16, 32], strides = [1, 1]} : vector<32x192xbf16> to vector<16x32xbf16>
    %110 = tpu.concatenate %108, %109 in 0 : vector<16x32xbf16>, vector<16x32xbf16> -> vector<32x32xbf16>
    %111 = vector.extract_strided_slice %44 {offsets = [16, 128], sizes = [16, 32], strides = [1, 1]} : vector<32x192xbf16> to vector<16x32xbf16>
    %112 = vector.extract_strided_slice %20 {offsets = [16, 0], sizes = [16, 32], strides = [1, 1]} : vector<32x64xbf16> to vector<16x32xbf16>
    %cst_40 = arith.constant dense<0.000000e+00> : vector<32x16xf32>
    %113 = tpu.matmul %110, %111, %cst_40 {dimension_numbers = #tpu.dot_dimension_numbers<[1], [1], [0], [0], [0, 0, 1, 0], [], []>} : vector<32x32xbf16>, vector<16x32xbf16>, vector<32x16xf32> -> vector<32x16xf32>
    %114 = arith.addf %113, %51 : vector<32x16xf32>
    %cst_41 = arith.constant dense<0xFF800000> : vector<32xf32>
    %115 = vector.multi_reduction <maximumf>, %114, %cst_41 [1] : vector<32x16xf32> to vector<32xf32>
    %116 = vector.shape_cast %115 : vector<32xf32> to vector<32x1xf32>
    %117 = vector.broadcast %116 : vector<32x1xf32> to vector<32x16xf32>
    %118 = arith.subf %114, %117 : vector<32x16xf32>
    %119 = math.exp %118 : vector<32x16xf32>
    %cst_42 = arith.constant dense<0.000000e+00> : vector<32xf32>
    %120 = vector.multi_reduction <add>, %119, %cst_42 [1] : vector<32x16xf32> to vector<32xf32>
    %121 = vector.shape_cast %120 : vector<32xf32> to vector<32x1xf32>
    %122 = tpu.reciprocal %121 {approx = true} : vector<32x1xf32> -> vector<32x1xf32>
    %123 = vector.broadcast %122 : vector<32x1xf32> to vector<32x16xf32>
    %124 = arith.mulf %119, %123 : vector<32x16xf32>
    %125 = arith.truncf %124 : vector<32x16xf32> to vector<32x16xbf16>
    %cst_43 = arith.constant dense<0.000000e+00> : vector<32x32xf32>
    %126 = tpu.matmul %125, %112, %cst_43 {dimension_numbers = #tpu.dot_dimension_numbers<[1], [0], [0], [1], [0, 0, 1, 1], [], []>} : vector<32x16xbf16>, vector<16x32xbf16>, vector<32x32xf32> -> vector<32x32xf32>
    %127 = vector.extract_strided_slice %126 {offsets = [0, 0], sizes = [16, 32], strides = [1, 1]} : vector<32x32xf32> to vector<16x32xf32>
    %128 = vector.extract_strided_slice %126 {offsets = [16, 0], sizes = [16, 32], strides = [1, 1]} : vector<32x32xf32> to vector<16x32xf32>
    %129 = tpu.concatenate %127, %128 in 1 : vector<16x32xf32>, vector<16x32xf32> -> vector<16x64xf32>
    %c0_44 = arith.constant 0 : index
    %c0_45 = arith.constant 0 : index
    %130 = vector.load %arg9[%c0_44, %c0_45] : memref<128x128xbf16, #tpu.memory_space<vmem>>, vector<64x128xbf16>
    %131 = arith.truncf %129 : vector<16x64xf32> to vector<16x64xbf16>
    %cst_46 = arith.constant dense<0.000000e+00> : vector<16x128xf32>
    %132 = tpu.matmul %131, %130, %cst_46 {dimension_numbers = #tpu.dot_dimension_numbers<[1], [0], [0], [1], [0, 0, 1, 1], [], []>} : vector<16x64xbf16>, vector<64x128xbf16>, vector<16x128xf32> -> vector<16x128xf32>
    %133 = arith.addf %107, %132 : vector<16x128xf32>
    %134 = vector.extract_strided_slice %44 {offsets = [16, 64], sizes = [16, 32], strides = [1, 1]} : vector<32x192xbf16> to vector<16x32xbf16>
    %135 = vector.extract_strided_slice %44 {offsets = [16, 96], sizes = [16, 32], strides = [1, 1]} : vector<32x192xbf16> to vector<16x32xbf16>
    %136 = tpu.concatenate %134, %135 in 0 : vector<16x32xbf16>, vector<16x32xbf16> -> vector<32x32xbf16>
    %137 = vector.extract_strided_slice %44 {offsets = [16, 160], sizes = [16, 32], strides = [1, 1]} : vector<32x192xbf16> to vector<16x32xbf16>
    %138 = vector.extract_strided_slice %20 {offsets = [16, 32], sizes = [16, 32], strides = [1, 1]} : vector<32x64xbf16> to vector<16x32xbf16>
    %cst_47 = arith.constant dense<0.000000e+00> : vector<32x16xf32>
    %139 = tpu.matmul %136, %137, %cst_47 {dimension_numbers = #tpu.dot_dimension_numbers<[1], [1], [0], [0], [0, 0, 1, 0], [], []>} : vector<32x32xbf16>, vector<16x32xbf16>, vector<32x16xf32> -> vector<32x16xf32>
    %140 = arith.addf %139, %51 : vector<32x16xf32>
    %cst_48 = arith.constant dense<0xFF800000> : vector<32xf32>
    %141 = vector.multi_reduction <maximumf>, %140, %cst_48 [1] : vector<32x16xf32> to vector<32xf32>
    %142 = vector.shape_cast %141 : vector<32xf32> to vector<32x1xf32>
    %143 = vector.broadcast %142 : vector<32x1xf32> to vector<32x16xf32>
    %144 = arith.subf %140, %143 : vector<32x16xf32>
    %145 = math.exp %144 : vector<32x16xf32>
    %cst_49 = arith.constant dense<0.000000e+00> : vector<32xf32>
    %146 = vector.multi_reduction <add>, %145, %cst_49 [1] : vector<32x16xf32> to vector<32xf32>
    %147 = vector.shape_cast %146 : vector<32xf32> to vector<32x1xf32>
    %148 = tpu.reciprocal %147 {approx = true} : vector<32x1xf32> -> vector<32x1xf32>
    %149 = vector.broadcast %148 : vector<32x1xf32> to vector<32x16xf32>
    %150 = arith.mulf %145, %149 : vector<32x16xf32>
    %151 = arith.truncf %150 : vector<32x16xf32> to vector<32x16xbf16>
    %cst_50 = arith.constant dense<0.000000e+00> : vector<32x32xf32>
    %152 = tpu.matmul %151, %138, %cst_50 {dimension_numbers = #tpu.dot_dimension_numbers<[1], [0], [0], [1], [0, 0, 1, 1], [], []>} : vector<32x16xbf16>, vector<16x32xbf16>, vector<32x32xf32> -> vector<32x32xf32>
    %153 = vector.extract_strided_slice %152 {offsets = [0, 0], sizes = [16, 32], strides = [1, 1]} : vector<32x32xf32> to vector<16x32xf32>
    %154 = vector.extract_strided_slice %152 {offsets = [16, 0], sizes = [16, 32], strides = [1, 1]} : vector<32x32xf32> to vector<16x32xf32>
    %155 = tpu.concatenate %153, %154 in 1 : vector<16x32xf32>, vector<16x32xf32> -> vector<16x64xf32>
    %c64_51 = arith.constant 64 : index
    %c0_52 = arith.constant 0 : index
    %156 = vector.load %arg9[%c64_51, %c0_52] : memref<128x128xbf16, #tpu.memory_space<vmem>>, vector<64x128xbf16>
    %157 = arith.truncf %155 : vector<16x64xf32> to vector<16x64xbf16>
    %cst_53 = arith.constant dense<0.000000e+00> : vector<16x128xf32>
    %158 = tpu.matmul %157, %156, %cst_53 {dimension_numbers = #tpu.dot_dimension_numbers<[1], [0], [0], [1], [0, 0, 1, 1], [], []>} : vector<16x64xbf16>, vector<64x128xbf16>, vector<16x128xf32> -> vector<16x128xf32>
    %159 = arith.addf %133, %158 : vector<16x128xf32>
    %160 = vector.extract_strided_slice %1 {offsets = [16, 0], sizes = [16, 128], strides = [1, 1]} : vector<32x128xf32> to vector<16x128xf32>
    %161 = arith.addf %160, %159 : vector<16x128xf32>
    %162 = tpu.concatenate %106, %161 in 0 : vector<16x128xf32>, vector<16x128xf32> -> vector<32x128xf32>
    %c0_54 = arith.constant 0 : index
    %c0_55 = arith.constant 0 : index
    %163 = vector.load %arg10[%c0_54, %c0_55] : memref<1x128xf32, #tpu.memory_space<vmem>>, vector<1x128xf32>
    %164 = arith.mulf %162, %162 : vector<32x128xf32>
    %cst_56 = arith.constant dense<0.000000e+00> : vector<32xf32>
    %165 = vector.multi_reduction <add>, %164, %cst_56 [1] : vector<32x128xf32> to vector<32xf32>
    %166 = vector.shape_cast %165 : vector<32xf32> to vector<32x1xf32>
    %cst_57 = arith.constant 1.280000e+02 : f32
    %167 = vector.broadcast %cst_57 : f32 to vector<32x1xf32>
    %168 = arith.divf %166, %167 : vector<32x1xf32>
    %cst_58 = arith.constant 9.99999997E-7 : f32
    %169 = vector.broadcast %cst_58 : f32 to vector<32x1xf32>
    %170 = arith.addf %168, %169 : vector<32x1xf32>
    %171 = math.rsqrt %170 : vector<32x1xf32>
    %172 = vector.broadcast %171 : vector<32x1xf32> to vector<32x128xf32>
    %173 = arith.mulf %162, %172 : vector<32x128xf32>
    %174 = vector.broadcast %163 : vector<1x128xf32> to vector<32x128xf32>
    %175 = arith.mulf %174, %173 : vector<32x128xf32>
    %176 = arith.truncf %175 : vector<32x128xf32> to vector<32x128xbf16>
    %c0_59 = arith.constant 0 : index
    %c0_60 = arith.constant 0 : index
    %177 = vector.load %arg11[%c0_59, %c0_60] : memref<128x512xbf16, #tpu.memory_space<vmem>>, vector<128x512xbf16>
    %cst_61 = arith.constant dense<0.000000e+00> : vector<32x512xf32>
    %178 = tpu.matmul %176, %177, %cst_61 {dimension_numbers = #tpu.dot_dimension_numbers<[1], [0], [0], [1], [0, 0, 1, 1], [], []>} : vector<32x128xbf16>, vector<128x512xbf16>, vector<32x512xf32> -> vector<32x512xf32>
    %179 = vector.extract_strided_slice %178 {offsets = [0, 0], sizes = [32, 256], strides = [1, 1]} : vector<32x512xf32> to vector<32x256xf32>
    %180 = vector.extract_strided_slice %178 {offsets = [0, 256], sizes = [32, 256], strides = [1, 1]} : vector<32x512xf32> to vector<32x256xf32>
    %181 = arith.negf %179 : vector<32x256xf32>
    %182 = math.exp %181 : vector<32x256xf32>
    %cst_62 = arith.constant 1.000000e+00 : f32
    %183 = vector.broadcast %cst_62 : f32 to vector<32x256xf32>
    %184 = arith.addf %183, %182 : vector<32x256xf32>
    %185 = arith.divf %183, %184 : vector<32x256xf32>
    %186 = arith.mulf %179, %185 : vector<32x256xf32>
    %187 = arith.mulf %186, %180 : vector<32x256xf32>
    %188 = arith.truncf %187 : vector<32x256xf32> to vector<32x256xbf16>
    %c0_63 = arith.constant 0 : index
    %c0_64 = arith.constant 0 : index
    %189 = vector.load %arg12[%c0_63, %c0_64] : memref<256x128xbf16, #tpu.memory_space<vmem>>, vector<256x128xbf16>
    %cst_65 = arith.constant dense<0.000000e+00> : vector<32x128xf32>
    %190 = tpu.matmul %188, %189, %cst_65 {dimension_numbers = #tpu.dot_dimension_numbers<[1], [0], [0], [1], [0, 0, 1, 1], [], []>} : vector<32x256xbf16>, vector<256x128xbf16>, vector<32x128xf32> -> vector<32x128xf32>
    %191 = arith.addf %162, %190 : vector<32x128xf32>
    %192 = vector.shape_cast %191 : vector<32x128xf32> to vector<2x16x128xf32>
    %c0_66 = arith.constant 0 : index
    %c0_67 = arith.constant 0 : index
    %c0_68 = arith.constant 0 : index
    %193 = vector.load %arg13[%c0_66, %c0_67, %c0_68] : memref<2x16x128xf32, #tpu.memory_space<vmem>>, vector<2x16x128xf32>
    tpu.vector_store %arg13[%c0_66, %c0_67, %c0_68], %192 {strides = array<i32>} : memref<2x16x128xf32, #tpu.memory_space<vmem>>, vector<2x16x128xf32>,
    return
  }
  func.func @transform_0(%arg0: i32) -> (i32, i32, i32) {
    %c0_i32 = arith.constant 0 : i32
    %c0_i32_0 = arith.constant 0 : i32
    %c0_i32_1 = arith.constant 0 : i32
    return %arg0, %c0_i32, %c0_i32_0 : i32, i32, i32
  }
  func.func @transform_1(%arg0: i32) -> (i32, i32) {
    %c0_i32 = arith.constant 0 : i32
    %c0_i32_0 = arith.constant 0 : i32
    %c0_i32_1 = arith.constant 0 : i32
    return %c0_i32, %c0_i32_0 : i32, i32
  }
  func.func @transform_2(%arg0: i32) -> (i32, i32) {
    %c0_i32 = arith.constant 0 : i32
    %c0_i32_0 = arith.constant 0 : i32
    %c0_i32_1 = arith.constant 0 : i32
    return %c0_i32, %c0_i32_0 : i32, i32
  }
  func.func @transform_3(%arg0: i32) -> (i32, i32) {
    %c0_i32 = arith.constant 0 : i32
    %c0_i32_0 = arith.constant 0 : i32
    %c0_i32_1 = arith.constant 0 : i32
    return %c0_i32, %c0_i32_0 : i32, i32
  }
  func.func @transform_4(%arg0: i32) -> (i32, i32) {
    %c0_i32 = arith.constant 0 : i32
    %c0_i32_0 = arith.constant 0 : i32
    %c0_i32_1 = arith.constant 0 : i32
    return %c0_i32, %c0_i32_0 : i32, i32
  }
  func.func @transform_5(%arg0: i32) -> (i32, i32) {
    %c0_i32 = arith.constant 0 : i32
    %c0_i32_0 = arith.constant 0 : i32
    %c0_i32_1 = arith.constant 0 : i32
    return %c0_i32, %c0_i32_0 : i32, i32
  }
  func.func @transform_6(%arg0: i32) -> (i32, i32) {
    %c0_i32 = arith.constant 0 : i32
    %c0_i32_0 = arith.constant 0 : i32
    %c0_i32_1 = arith.constant 0 : i32
    return %c0_i32, %c0_i32_0 : i32, i32
  }
  func.func @transform_7(%arg0: i32) -> (i32, i32) {
    %c0_i32 = arith.constant 0 : i32
    %c0_i32_0 = arith.constant 0 : i32
    %c0_i32_1 = arith.constant 0 : i32
    return %c0_i32, %c0_i32_0 : i32, i32
  }
  func.func @transform_8(%arg0: i32) -> (i32, i32) {
    %c0_i32 = arith.constant 0 : i32
    %c0_i32_0 = arith.constant 0 : i32
    %c0_i32_1 = arith.constant 0 : i32
    return %c0_i32, %c0_i32_0 : i32, i32
  }
  func.func @transform_9(%arg0: i32) -> (i32, i32) {
    %c0_i32 = arith.constant 0 : i32
    %c0_i32_0 = arith.constant 0 : i32
    %c0_i32_1 = arith.constant 0 : i32
    return %c0_i32, %c0_i32_0 : i32, i32
  }
  func.func @transform_10(%arg0: i32) -> (i32, i32) {
    %c0_i32 = arith.constant 0 : i32
    %c0_i32_0 = arith.constant 0 : i32
    %c0_i32_1 = arith.constant 0 : i32
    return %c0_i32, %c0_i32_0 : i32, i32
  }
  func.func @transform_11(%arg0: i32) -> (i32, i32) {
    %c0_i32 = arith.constant 0 : i32
    %c0_i32_0 = arith.constant 0 : i32
    %c0_i32_1 = arith.constant 0 : i32
    return %c0_i32, %c0_i32_0 : i32, i32
  }
  func.func @transform_12(%arg0: i32) -> (i32, i32, i32) {
    %c0_i32 = arith.constant 0 : i32
    %c0_i32_0 = arith.constant 0 : i32
    %c0_i32_1 = arith.constant 0 : i32
    return %arg0, %c0_i32, %c0_i32_0 : i32, i32, i32
  }
}

</mosaic_0001>

<bundles_post_ra>
// kernel: forward.1
= control target key start
LH: loop header
LB: loop body
LE: loop exit
PB: predicated region body
PF: predicated region fallthrough
CT: control target
= control target key end

     0   :  { %v3007_v22 = vmov 0   ;;  %s3845_s0 = inlined_call_operand.vmem [shape: f32[2,16,128], index: 0, kind: input, shape index: {}]   ;;  %s3846_s1 = inlined_call_operand.vmem [shape: f32[16,192], index: 1, kind: input, shape index: {}]   ;;  %s3847_s2 = inlined_call_operand.vmem [shape: f32[16,192], index: 2, kind: input, shape index: {}]   ;;  %s3848_s3 = inlined_call_operand.vmem [shape: bf16[192,192], index: 3, kind: input, shape index: {}]   ;;  %s3849_s4 = inlined_call_operand.vmem [shape: bf16[192,192], index: 4, kind: input, shape index: {}]   ;;  %s3850_s5 = inlined_call_operand.vmem [shape: f32[1,128], index: 5, kind: input, shape index: {}]   ;;  %s3851_s6 = inlined_call_operand.vmem [shape: bf16[128,256], index: 6, kind: input, shape index: {}]   ;;  %s3852_s7 = inlined_call_operand.vmem [shape: f32[1,192], index: 7, kind: input, shape index: {}]   ;;  %s3853_s8 = inlined_call_operand.vmem [shape: bf16[128,128], index: 8, kind: input, shape index: {}]   ;;  %s3854_s9 = inlined_call_operand.vmem [shape: f32[1,128], index: 9, kind: input, shape index: {}]   ;;  %s3855_s10 = inlined_call_operand.vmem [shape: bf16[128,512], index: 10, kind: input, shape index: {}]   ;;  %s3856_s11 = inlined_call_operand.vmem [shape: bf16[256,128], index: 11, kind: input, shape index: {}]   ;;  %s3857_s12 = inlined_call_operand.hbm [shape: f32[2,16,128], index: 12, kind: output, shape index: {}]  }
   0x1   :  { %v3084_v0 = vld [vmem:[%s3845_s0] sm:$0xff]  ;;  %v3089_v1 = vld [vmem:[%s3845_s0 + $0x8] sm:$0xff]  ;;  %v3094_v2 = vld [vmem:[%s3845_s0 + $0x10] sm:$0xff]  ;;  %217 = vmatprep.mubr.bf16.mxu0 %v3007_v22 }
   0x2   :  { %v48_v3 = vmul.f32 %v3084_v0, %v3084_v0  ;;  %v50_v4 = vmul.f32 %v3094_v2, %v3094_v2  ;;  %v3103_v5 = vld [vmem:[%s3845_s0 + $0x18] sm:$0xff]  ;;  %v2683_v6 = vld [vmem:[%s3851_s6 + $0x4] ss:$8 sps:$4 sm:$0xff]   ;;  %v2685_v7 = vld [vmem:[%s3851_s6] ss:$8 sps:$4 sm:$0xff]   ;;  %v49_v8 = vmul.f32 %v3089_v1, %v3089_v1 }
   0x3   :  { %v51_v9 = vmul.f32 %v3103_v5, %v3103_v5  ;;  %v2686_v10 = vld [vmem:[%s3851_s6 + $0x14] ss:$8 sps:$4 sm:$0xff]   ;;  %v2688_v11 = vld [vmem:[%s3851_s6 + $0x10] ss:$8 sps:$4 sm:$0xff]   ;;  %185 = vmatprep.subr.bf16.mxu0 %v2683_v6  ;;  %v2689_v12 = vld [vmem:[%s3851_s6 + $0x24] ss:$8 sps:$4 sm:$0xff]  }
   0x4   :  { %52 = vadd.xlane.f32.xlu0 %v48_v3  ;;  %56 = vadd.xlane.f32.xlu1 %v50_v4  ;;  %v2691_v13 = vld [vmem:[%s3851_s6 + $0x20] ss:$8 sps:$4 sm:$0xff]   ;;  %v2692_v14 = vld [vmem:[%s3851_s6 + $0x34] ss:$8 sps:$4 sm:$0xff]   ;;  %v2694_v15 = vld [vmem:[%s3851_s6 + $0x30] ss:$8 sps:$4 sm:$0xff]  }
   0x5   :  { %186 = vmatpush1.bf16.msra.mxu0 %v2685_v7  ;;  %v2695_v16 = vld [vmem:[%s3851_s6 + $0x44] ss:$8 sps:$4 sm:$0xff]   ;;  %v2697_v17 = vld [vmem:[%s3851_s6 + $0x40] ss:$8 sps:$4 sm:$0xff]   ;;  %v2698_v18 = vld [vmem:[%s3851_s6 + $0x54] ss:$8 sps:$4 sm:$0xff]  }
   0x6   :  { %187 = vmatprep.subr.bf16.mxu0 %v2686_v10  ;;  %v2700_v19 = vld [vmem:[%s3851_s6 + $0x50] ss:$8 sps:$4 sm:$0xff]   ;;  %v2701_v20 = vld [vmem:[%s3851_s6 + $0x64] ss:$8 sps:$4 sm:$0xff]   ;;  %v2703_v21 = vld [vmem:[%s3851_s6 + $0x60] ss:$8 sps:$4 sm:$0xff]  }
   0x7   :  { %v2704_v23 = vld [vmem:[%s3851_s6 + $0x74] ss:$8 sps:$4 sm:$0xff]   ;;  %v2706_v24 = vld [vmem:[%s3851_s6 + $0x70] ss:$8 sps:$4 sm:$0xff]   ;;  %v2707_v25 = vld [vmem:[%s3849_s4 + $0x4] ss:$8 sps:$4 sm:$0xff]  }
   0x8   :  { %54 = vadd.xlane.f32.xlu0 %v49_v8  ;;  %58 = vadd.xlane.f32.xlu1 %v51_v9  ;;  %v2709_v26 = vld [vmem:[%s3849_s4] ss:$8 sps:$4 sm:$0xff]   ;;  %v2710_v27 = vld [vmem:[%s3849_s4 + $0x14] ss:$8 sps:$4 sm:$0xff]   ;;  %v2712_v28 = vld [vmem:[%s3849_s4 + $0x10] ss:$8 sps:$4 sm:$0xff]  }
   0x9   :  { %188 = vmatpush1.bf16.msra.mxu0 %v2688_v11  ;;  %403 = vmatprep.subr.bf16.mxu1 %v2707_v25  ;;  %v2713_v29 = vld [vmem:[%s3849_s4 + $0x24] ss:$8 sps:$4 sm:$0xff]   ;;  %v2715_v30 = vld [vmem:[%s3849_s4 + $0x20] ss:$8 sps:$4 sm:$0xff]   ;;  %v2716_v31 = vld [vmem:[%s3849_s4 + $0x34] ss:$8 sps:$4 sm:$0xff]  }
   0xa   :  { %189 = vmatprep.subr.bf16.mxu0 %v2689_v12  ;;  %404 = vmatpush1.bf16.msra.mxu1 %v2709_v26  ;;  %v2718_v32 = vld [vmem:[%s3849_s4 + $0x30] ss:$8 sps:$4 sm:$0xff]  }
   0xb   :  { %405 = vmatprep.subr.bf16.mxu1 %v2710_v27 }
   0xd   :  { %190 = vmatpush1.bf16.msra.mxu0 %v2691_v13 }
   0xe   :  { %191 = vmatprep.subr.bf16.mxu0 %v2692_v14  ;;  %406 = vmatpush1.bf16.msra.mxu1 %v2712_v28 }
   0xf   :  { %407 = vmatprep.subr.bf16.mxu1 %v2713_v29 }
  0x11   :  { %192 = vmatpush1.bf16.msra.mxu0 %v2694_v15 }
  0x12   :  { %193 = vmatprep.subr.bf16.mxu0 %v2695_v16  ;;  %408 = vmatpush1.bf16.msra.mxu1 %v2715_v30 }
  0x15   :  { %194 = vmatpush1.bf16.msra.mxu0 %v2697_v17 }
  0x16   :  { %195 = vmatprep.subr.bf16.mxu0 %v2698_v18 }
  0x19   :  { %196 = vmatpush1.bf16.msra.mxu0 %v2700_v19 }
  0x1a   :  { %197 = vmatprep.subr.bf16.mxu0 %v2701_v20 }
  0x1d   :  { %198 = vmatpush1.bf16.msra.mxu0 %v2703_v21 }
  0x1e   :  { %199 = vmatprep.subr.bf16.mxu0 %v2704_v23 }
  0x21   :  { %200 = vmatpush1.bf16.msra.mxu0 %v2706_v24 }
  0x22   :  { %17 = vsyncpa [#allocation3], 0  ;;  %409 = vmatprep.subr.bf16.mxu1 %v2716_v31  ;;  %v2719_v33 = vld [vmem:[%s3849_s4 + $0x44] ss:$8 sps:$4 sm:$0xff]   ;;  %v2721_v34 = vld [vmem:[%s3849_s4 + $0x40] ss:$8 sps:$4 sm:$0xff]  }
  0x23   :  { %410 = vmatpush1.bf16.msra.mxu1 %v2718_v32  ;;  %v2722_v35 = vld [vmem:[%s3849_s4 + $0x54] ss:$8 sps:$4 sm:$0xff]   ;;  %v2724_v36 = vld [vmem:[%s3849_s4 + $0x50] ss:$8 sps:$4 sm:$0xff]   ;;  %v2725_v37 = vld [vmem:[%s3849_s4 + $0x64] ss:$8 sps:$4 sm:$0xff]  }
  0x24   :  { %411 = vmatprep.subr.bf16.mxu1 %v2719_v33  ;;  %v2727_v38 = vld [vmem:[%s3849_s4 + $0x60] ss:$8 sps:$4 sm:$0xff]   ;;  %v2728_v39 = vld [vmem:[%s3849_s4 + $0x74] ss:$8 sps:$4 sm:$0xff]   ;;  %v2730_v40 = vld [vmem:[%s3849_s4 + $0x70] ss:$8 sps:$4 sm:$0xff]  }
  0x25   :  { %v2731_v41 = vld [vmem:[%s3849_s4 + $0x84] ss:$8 sps:$4 sm:$0xff]   ;;  %v2733_v42 = vld [vmem:[%s3849_s4 + $0x80] ss:$8 sps:$4 sm:$0xff]   ;;  %v2734_v43 = vld [vmem:[%s3849_s4 + $0x94] ss:$8 sps:$4 sm:$0xff]  }
  0x26   :  { %v2736_v44 = vld [vmem:[%s3849_s4 + $0x90] ss:$8 sps:$4 sm:$0xff]   ;;  %v2328_v61 = vld [vmem:[%s3850_s5] ss:$0 sm:$0xff]  ;;  %v2737_v11 = vld [vmem:[%s3849_s4 + $0xa4] ss:$8 sps:$4 sm:$0xff]  }
  0x27   :  { %412 = vmatpush1.bf16.msra.mxu1 %v2721_v34  ;;  %v2743_v12 = vld [vmem:[%s3848_s3] ss:$8 sps:$4 sm:$0xff]   ;;  %v2745_v13 = vld [vmem:[%s3848_s3 + $0x4] ss:$8 sps:$4 sm:$0xff]   ;;  %v2748_v14 = vld [vmem:[%s3848_s3 + $0x14] ss:$8 sps:$4 sm:$0xff]  }
  0x28   :  { %413 = vmatprep.subr.bf16.mxu1 %v2722_v35  ;;  %662 = vmatprep.subr.bf16.mxu0 %v2745_v13  ;;  %v2746_v15 = vld [vmem:[%s3848_s3 + $0x10] ss:$8 sps:$4 sm:$0xff]   ;;  %v2751_v16 = vld [vmem:[%s3848_s3 + $0x24] ss:$8 sps:$4 sm:$0xff]   ;;  %v2749_v17 = vld [vmem:[%s3848_s3 + $0x20] ss:$8 sps:$4 sm:$0xff]  }
  0x29   :  { %v2754_v18 = vld [vmem:[%s3848_s3 + $0x34] ss:$8 sps:$4 sm:$0xff]   ;;  %v2752_v19 = vld [vmem:[%s3848_s3 + $0x30] ss:$8 sps:$4 sm:$0xff]   ;;  %v2757_v20 = vld [vmem:[%s3848_s3 + $0x44] ss:$8 sps:$4 sm:$0xff]  }
  0x2a   :  { %v2755_v21 = vld [vmem:[%s3848_s3 + $0x40] ss:$8 sps:$4 sm:$0xff]   ;;  %v2760_v23 = vld [vmem:[%s3848_s3 + $0x54] ss:$8 sps:$4 sm:$0xff]   ;;  %v2758_v24 = vld [vmem:[%s3848_s3 + $0x50] ss:$8 sps:$4 sm:$0xff]  }
  0x2b   :  { %414 = vmatpush1.bf16.msra.mxu1 %v2724_v36  ;;  %vm396_vm0 = vcmask 523264   ;;  %vm763_vm1 = vcmask 261120   ;;  %vm822_vm3 = vcmask 130048   ;;  %s3011_s24 = smov 32   ;;  %vm3012_vm5 = vmmov 0  }
  0x2c   :  { %415 = vmatprep.subr.bf16.mxu1 %v2725_v37 }
  0x2f   :  { %416 = vmatpush1.bf16.msra.mxu1 %v2727_v38 }
  0x30   :  { %417 = vmatprep.subr.bf16.mxu1 %v2728_v39 }
  0x33   :  { %418 = vmatpush1.bf16.msra.mxu1 %v2730_v40 }
  0x34   :  { %419 = vmatprep.subr.bf16.mxu1 %v2731_v41 }
  0x37   :  { %420 = vmatpush1.bf16.msra.mxu1 %v2733_v42 }
  0x38   :  { %421 = vmatprep.subr.bf16.mxu1 %v2734_v43 }
  0x3b   :  { %422 = vmatpush1.bf16.msra.mxu1 %v2736_v44 }
  0x3c   :  { %423 = vmatprep.subr.bf16.mxu1 %v2737_v11 }
  0x91   :  { %v53_v45 = vpop.xlane.xlu0 %52  ;;  %v57_v46 = vpop.xlane.xlu1 %56 }
  0x92   :  { %v61_v47 = vmul.f32 0.0078125, %v53_v45  ;;  %v63_v48 = vmul.f32 0.0078125, %v57_v46 }
  0x94   :  { %v65_v49 = vadd.f32 1e-06, %v61_v47  ;;  %v67_v51 = vadd.f32 1e-06, %v63_v48  ;;  %v2763_v47 = vld [vmem:[%s3848_s3 + $0x64] ss:$8 sps:$4 sm:$0xff]  }
  0x95   :  { %v55_v50 = vpop.xlane.xlu0 %54  ;;  %v59_v52 = vpop.xlane.xlu1 %58  ;;  %v2761_v48 = vld [vmem:[%s3848_s3 + $0x60] ss:$8 sps:$4 sm:$0xff]  }
  0x96   :  { %2851 = vrsqrt.f32 %v65_v49  ;;  %v62_v53 = vmul.f32 0.0078125, %v55_v50  ;;  %v64_v54 = vmul.f32 0.0078125, %v59_v52  ;;  %v2766_v49 = vld [vmem:[%s3848_s3 + $0x74] ss:$8 sps:$4 sm:$0xff]   ;;  %v2764_v50 = vld [vmem:[%s3848_s3 + $0x70] ss:$8 sps:$4 sm:$0xff]  }
  0x97   :  { %2853 = vrsqrt.f32 %v67_v51  ;;  %v2769_v51 = vld [vmem:[%s3848_s3 + $0x84] ss:$8 sps:$4 sm:$0xff]   ;;  %v2767_v52 = vld [vmem:[%s3848_s3 + $0x80] ss:$8 sps:$4 sm:$0xff]  }
  0x98   :  { %v66_v55 = vadd.f32 1e-06, %v62_v53  ;;  %v68_v56 = vadd.f32 1e-06, %v64_v54  ;;  %v2772_v53 = vld [vmem:[%s3848_s3 + $0x94] ss:$8 sps:$4 sm:$0xff]  }
  0x99   :  { %v2770_v54 = vld [vmem:[%s3848_s3 + $0x90] ss:$8 sps:$4 sm:$0xff]  }
  0x9a   :  { %2855 = vrsqrt.f32 %v66_v55  ;;  %v2775_v55 = vld [vmem:[%s3848_s3 + $0xa4] ss:$8 sps:$4 sm:$0xff]  }
  0x9b   :  { %2857 = vrsqrt.f32 %v68_v56  ;;  %v2773_v56 = vld [vmem:[%s3848_s3 + $0xa0] ss:$8 sps:$4 sm:$0xff]  }
  0xa0   :  { %v2852_v57 = vpop.eup %2851 }
  0xa1   :  { %v2854_v58 = vpop.eup %2853  ;;  %v73_v59 = vmul.f32 %v2852_v57, %v3084_v0  ;;  %v2778_v57 = vld [vmem:[%s3848_s3 + $0xb4] ss:$8 sps:$4 sm:$0xff]  }
  0xa2   :  { %v75_v6 = vmul.f32 %v2854_v58, %v3094_v2  ;;  %v2740_v2 = vld [vmem:[%s3849_s4 + $0xb4] ss:$8 sps:$4 sm:$0xff]   ;;  %v2776_v58 = vld [vmem:[%s3848_s3 + $0xb0] ss:$8 sps:$4 sm:$0xff]  }
  0xa3   :  { %v83_v3 = vmul.f32 %v2328_v61, %v73_v59 }
  0xa4   :  { %v2856_v60 = vpop.eup %2855  ;;  %v85_v9 = vmul.f32 %v2328_v61, %v75_v6 }
  0xa5   :  { %v2858_v62 = vpop.eup %2857  ;;  %v74_v63 = vmul.f32 %v2856_v60, %v3089_v1  ;;  %v2739_v1 = vld [vmem:[%s3849_s4 + $0xa0] ss:$8 sps:$4 sm:$0xff]  }
  0xa6   :  { %v76_v7 = vmul.f32 %v2858_v62, %v3103_v5  ;;  %424 = vmatpush1.bf16.msra.mxu1 %v2739_v1  ;;  %v2742_v5 = vld [vmem:[%s3849_s4 + $0xb0] ss:$8 sps:$4 sm:$0xff]  }
  0xa7   :  { %v84_v4 = vmul.f32 %v2328_v61, %v74_v63  ;;  %425 = vmatprep.subr.bf16.mxu1 %v2740_v2 }
  0xa8   :  { %v86_v10 = vmul.f32 %v2328_v61, %v76_v7 }
  0xa9   :  { %v87_v8 = vpack.c.bf16 %v84_v4, %v83_v3 }
  0xaa   :  { %v88_v0 = vpack.c.bf16 %v86_v10, %v85_v9  ;;  %426 = vmatpush1.bf16.msra.mxu1 %v2742_v5  ;;  %v490_v9 = vlaneseq }
  0xab   :  { %218 = vmatmul.mubr.bf16.vlgmr.msra.gmra.mrb[0].mxu0 %v87_v8 }
  0xac   :  { %227 = vmatprep.mubr.bf16.mxu0 %v3007_v22  ;;  %663 = vmatpush1.bf16.msra.mxu0 %v2743_v12  ;;  %v3353_v1 = vshrl.u32 %v490_v9, 7 }
  0xad   :  { %664 = vmatprep.subr.bf16.mxu0 %v2748_v14 }
  0xb0   :  { %665 = vmatpush1.bf16.msra.mxu0 %v2746_v15 }
  0xb1   :  { %666 = vmatprep.subr.bf16.mxu0 %v2751_v16 }
  0xb3   :  { %228 = vmatmul.mubr.bf16.gmra.mrb[4].mxu0 %v88_v0 }
  0xb4   :  { %667 = vmatpush1.bf16.msra.mxu0 %v2749_v17 }
  0xb5   :  { %668 = vmatprep.subr.bf16.mxu0 %v2754_v18 }
  0xb8   :  { %669 = vmatpush1.bf16.msra.mxu0 %v2752_v19  ;;  %v492_v19 = vsub.s32 0, %v3353_v1 }
  0xb9   :  { %670 = vmatprep.subr.bf16.mxu0 %v2757_v20 }
  0xbc   :  { %671 = vmatpush1.bf16.msra.mxu0 %v2755_v21  ;;  %v464_v21 = vld [vmem:[%s3852_s7] sm:$0x3]  ;;  %s3010_s7 = smov 64  }
  0xbd   :  { %672 = vmatprep.subr.bf16.mxu0 %v2760_v23  ;;  %v496_v23 = vsub.s32 1, %v3353_v1 }
  0xc0   :  { %673 = vmatpush1.bf16.msra.mxu0 %v2758_v24 }
  0xc1   :  { %674 = vmatprep.subr.bf16.mxu0 %v2763_v47 }
  0xc4   :  { %675 = vmatpush1.bf16.msra.mxu0 %v2761_v48 }
  0xc5   :  { %676 = vmatprep.subr.bf16.mxu0 %v2766_v49 }
  0xc8   :  { %677 = vmatpush1.bf16.msra.mxu0 %v2764_v50 }
  0xc9   :  { %678 = vmatprep.subr.bf16.mxu0 %v2769_v51 }
  0xcc   :  { %679 = vmatpush1.bf16.msra.mxu0 %v2767_v52 }
  0xcd   :  { %680 = vmatprep.subr.bf16.mxu0 %v2772_v53 }
  0xd0   :  { %681 = vmatpush1.bf16.msra.mxu0 %v2770_v54 }
  0xd1   :  { %682 = vmatprep.subr.bf16.mxu0 %v2775_v55 }
  0xd4   :  { %683 = vmatpush1.bf16.msra.mxu0 %v2773_v56 }
  0xd5   :  { %684 = vmatprep.subr.bf16.mxu0 %v2778_v57  ;;  %v715_v57 = vld [vmem:[%s3846_s1] sm:$0xff] }
  0xd8   :  { %685 = vmatpush1.bf16.msra.mxu0 %v2776_v58 }
 0x17e   :  { %v3274_v25 = vpop.f32.mrb[0].mxu0 }
 0x17f   :  { %v3276_v26 = vpop.f32.mrb[1].mxu0  ;;  %v240_v28 = vmul.f32 %v3274_v25, %v3274_v25 }
 0x180   :  { %v3278_v27 = vpop.f32.mrb[2].mxu0  ;;  %v241_v32 = vmul.f32 %v3276_v26, %v3276_v26 }
 0x181   :  { %v242_v29 = vmul.f32 %v3278_v27, %v3278_v27  ;;  %v3284_v30 = vpop.f32.mrb[3].mxu0 }
 0x182   :  { %v3288_v31 = vpack.c.bf16 %v3284_v30, %v3276_v26  ;;  %v243_v33 = vmul.f32 %v3284_v30, %v3284_v30 }
 0x183   :  { %v248_v34 = vpack.c.bf16 %v242_v29, %v240_v28 }
 0x184   :  { %v249_v35 = vpack.c.bf16 %v243_v33, %v241_v32  ;;  %v493_v33 = vrot.slane %v464_v21, %v492_v19 }
 0x186   :  { %v3294_v36 = vpop.f32.mrb[4].mxu0  ;;  %2369 = vmatprep.mubr.msk.bf16.mxu1 %vm396_vm0, %v249_v35 }
 0x187   :  { %v244_v37 = vmul.f32 %v3294_v36, %v3294_v36  ;;  %v3299_v38 = vpop.f32.mrb[5].mxu0  ;;  %436 = vmatmul.mubr.bf16.vlgmr.msra.gmra.mrb[0].mxu1 %v248_v34 }
 0x188   :  { %v245_v39 = vmul.f32 %v3299_v38, %v3299_v38  ;;  %v3303_v40 = vpop.f32.mrb[6].mxu0 }
 0x189   :  { %v246_v41 = vmul.f32 %v3303_v40, %v3303_v40  ;;  %v3307_v42 = vpop.f32.mrb[7].mxu0 }
 0x18a   :  { %v3311_v43 = vpack.c.bf16 %v3307_v42, %v3299_v38  ;;  %v247_v44 = vmul.f32 %v3307_v42, %v3307_v42 }
 0x18b   :  { %v250_v45 = vpack.c.bf16 %v246_v41, %v244_v37  ;;  %v497_v37 = vrot.slane %v464_v21, %v496_v23 }
 0x18c   :  { %v251_v46 = vpack.c.bf16 %v247_v44, %v245_v39 }
 0x18e   :  { %2370 = vmatprep.mubr.msk.bf16.mxu1 %vm396_vm0, %v251_v46 }
 0x18f   :  { %446 = vmatmul.mubr.bf16.gmra.mrb[4].mxu1 %v250_v45 }
 0x25a   :  { %v437_v59 = vpop.f32.mrb[0].mxu1 }
 0x25b   :  { %v456_v60 = vmul.f32 0.03125, %v437_v59  ;;  %v439_v61 = vpop.f32.mrb[1].mxu1 }
 0x25c   :  { %v457_v62 = vmul.f32 0.03125, %v439_v61  ;;  %v441_v63 = vpop.f32.mrb[2].mxu1 }
 0x25d   :  { %v465_v3 = vadd.f32 1e-06, %v456_v60  ;;  %v458_v4 = vmul.f32 0.03125, %v441_v63  ;;  %v443_v6 = vpop.f32.mrb[3].mxu1 }
 0x25e   :  { %v466_v7 = vadd.f32 1e-06, %v457_v62  ;;  %v459_v8 = vmul.f32 0.03125, %v443_v6  ;;  %v720_v6 = vld [vmem:[%s3847_s2 + $0x8] sm:$0xff] }
 0x25f   :  { %2859 = vrsqrt.f32 %v465_v3  ;;  %v467_v10 = vadd.f32 1e-06, %v458_v4  ;;  %v719_v4 = vld [vmem:[%s3847_s2] sm:$0xff] }
 0x260   :  { %2861 = vrsqrt.f32 %v466_v7  ;;  %v468_v0 = vadd.f32 1e-06, %v459_v8  ;;  %v721_v8 = vld [vmem:[%s3847_s2 + $0x10] sm:$0xff] }
 0x261   :  { %2863 = vrsqrt.f32 %v467_v10 }
 0x262   :  { %2865 = vrsqrt.f32 %v468_v0  ;;  %v447_v11 = vpop.f32.mrb[4].mxu1 }
 0x263   :  { %v460_v2 = vmul.f32 0.03125, %v447_v11  ;;  %v449_v5 = vpop.f32.mrb[5].mxu1 }
 0x264   :  { %v461_v12 = vmul.f32 0.03125, %v449_v5  ;;  %v451_v13 = vpop.f32.mrb[6].mxu1 }
 0x265   :  { %v469_v14 = vadd.f32 1e-06, %v460_v2  ;;  %v462_v15 = vmul.f32 0.03125, %v451_v13  ;;  %v453_v16 = vpop.f32.mrb[7].mxu1  ;;  %v722_v2 = vld [vmem:[%s3847_s2 + $0x18] sm:$0xff]  ;;  %s3008_s2 = smov 96  }
 0x266   :  { %v470_v17 = vadd.f32 1e-06, %v461_v12  ;;  %v463_v18 = vmul.f32 0.03125, %v453_v16 }
 0x267   :  { %2867 = vrsqrt.f32 %v469_v14  ;;  %v471_v20 = vadd.f32 1e-06, %v462_v15 }
 0x268   :  { %2869 = vrsqrt.f32 %v470_v17  ;;  %v472_v24 = vadd.f32 1e-06, %v463_v18 }
 0x269   :  { %v2860_v28 = vpop.eup %2859  ;;  %2871 = vrsqrt.f32 %v471_v20 }
 0x26a   :  { %v2862_v29 = vpop.eup %2861  ;;  %v481_v32 = vmul.f32 %v2860_v28, %v3274_v25  ;;  %2873 = vrsqrt.f32 %v472_v24 }
 0x26b   :  { %v2864_v34 = vpop.eup %2863  ;;  %v482_v35 = vmul.f32 %v2862_v29, %v3276_v26 }
 0x26c   :  { %v2866_v39 = vpop.eup %2865  ;;  %v483_v41 = vmul.f32 %v2864_v34, %v3278_v27  ;;  %v500_v45 = vmul.f32 %v493_v33, %v481_v32 }
 0x26d   :  { %v484_v44 = vmul.f32 %v2866_v39, %v3284_v30  ;;  %v501_v47 = vmul.f32 %v497_v37, %v482_v35 }
 0x26e   :  { %v502_v46 = vmul.f32 %v493_v33, %v483_v41  ;;  %v723_v10 = vmul.f32 %v715_v57, %v500_v45 }
 0x26f   :  { %v503_v48 = vmul.f32 %v497_v37, %v484_v44 }
 0x270   :  { %v508_v49 = vpack.c.bf16 %v502_v46, %v500_v45 }
 0x271   :  { %v2868_v50 = vpop.eup %2867  ;;  %v509_v51 = vpack.c.bf16 %v503_v48, %v501_v47 }
 0x272   :  { %v2870_v52 = vpop.eup %2869  ;;  %v485_v25 = vmul.f32 %v2868_v50, %v3294_v36  ;;  %v716_v36 = vld [vmem:[%s3846_s1 + $0x8] sm:$0xff] }
 0x273   :  { %v2872_v53 = vpop.eup %2871  ;;  %2395 = vmatprep.mubr.msk.bf16.mxu0 %vm396_vm0, %v509_v51  ;;  %v486_v26 = vmul.f32 %v2870_v52, %v3299_v38  ;;  %v717_v38 = vld [vmem:[%s3846_s1 + $0x10] sm:$0xff]  ;;  %v724_v5 = vmul.f32 %v716_v36, %v501_v47  ;;  %v3009_v47 = vmov 0.0   ;;  %v3414_v52 = vld [vmem:[%s3853_s8 + $0x20] sm:$0xff]  }
 0x274   :  { %v2874_v54 = vpop.eup %2873  ;;  %695 = vmatmul.mubr.bf16.vlgmr.msra.gmra.mrb[8].mxu0 %v508_v49  ;;  %v487_v27 = vmul.f32 %v2872_v53, %v3303_v40  ;;  %v504_v30 = vmul.f32 %v493_v33, %v485_v25  ;;  %v725_v15 = vmul.f32 %v717_v38, %v502_v46  ;;  %v3424_v53 = vld [vmem:[%s3853_s8 + $0x28] sm:$0xff]  }
 0x275   :  { %v488_v55 = vmul.f32 %v2874_v54, %v3307_v42  ;;  %v505_v56 = vmul.f32 %v497_v37, %v486_v26  ;;  %v718_v42 = vld [vmem:[%s3846_s1 + $0x18] sm:$0xff]  ;;  %v3431_v26 = vld [vmem:[%s3853_s8 + $0x30] sm:$0xff]  }
 0x276   :  { %v506_v58 = vmul.f32 %v493_v33, %v487_v27  ;;  %v727_v59 = vmul.f32 %v715_v57, %v504_v30  ;;  %v726_v19 = vmul.f32 %v718_v42, %v503_v48  ;;  %v3438_v54 = vld [vmem:[%s3853_s8 + $0x38] sm:$0xff]   ;;  %v755_v27 = vand.u32 127, %v490_v9 }
 0x277   :  { %v507_v60 = vmul.f32 %v497_v37, %v488_v55  ;;  %v728_v40 = vmul.f32 %v716_v36, %v505_v56 }
 0x278   :  { %v510_v61 = vpack.c.bf16 %v506_v58, %v504_v30  ;;  %v729_v62 = vmul.f32 %v717_v38, %v506_v58  ;;  %vm756_vm2 = vcmp.gt.s32.totalorder %v755_v27, %v3353_v1  ;;  %v753_v30 = vadd.s32 8, %v3353_v1 }
 0x279   :  { %v511_v63 = vpack.c.bf16 %v507_v60, %v505_v56  ;;  %v730_v3 = vmul.f32 %v718_v42, %v507_v60  ;;  %v3448_v55 = vsel %vm756_vm2, -1e+30, %v3009_v47 }
 0x27a   :  { %vm757_vm4 = vcmp.gt.s32.totalorder %v755_v27, %v753_v30 }
 0x27b   :  { %2396 = vmatprep.mubr.msk.bf16.mxu0 %vm396_vm0, %v511_v63  ;;  %v3454_v9 = vsel %vm757_vm4, -1e+30, %v3009_v47 }
 0x27c   :  { %705 = vmatmul.mubr.bf16.gmra.mrb[12].mxu0 %v510_v61 }
 0x347   :  { %v696_v7 = vpop.f32.mrb[8].mxu0 }
 0x348   :  { %v731_v0 = vmul.f32 %v719_v4, %v696_v7  ;;  %v698_v11 = vpop.f32.mrb[9].mxu0 }
 0x349   :  { %v732_v12 = vmul.f32 %v720_v6, %v698_v11  ;;  %v700_v13 = vpop.f32.mrb[10].mxu0 }
 0x34a   :  { %v739_v14 = vadd.f32 %v731_v0, %v723_v10  ;;  %v733_v16 = vmul.f32 %v721_v8, %v700_v13  ;;  %v702_v17 = vpop.f32.mrb[11].mxu0 }
 0x34b   :  { %v740_v18 = vadd.f32 %v732_v12, %v724_v5  ;;  %v734_v20 = vmul.f32 %v722_v2, %v702_v17 }
 0x34c   :  { %v741_v21 = vadd.f32 %v733_v16, %v725_v15 }
 0x34d   :  { %v742_v23 = vadd.f32 %v734_v20, %v726_v19 }
 0x34e   :  { %v3394_v24 = vpack.c.bf16 %v741_v21, %v739_v14 }
 0x34f   :  { %v3396_v28 = vpack.c.bf16 %v742_v23, %v740_v18  ;;  %v706_v29 = vpop.f32.mrb[12].mxu0 }
 0x350   :  { %v735_v32 = vmul.f32 %v719_v4, %v706_v29  ;;  %761 = vrot.lane.b32.xlu0 %v3394_v24, %s3008_s2  ;;  %v708_v33 = vpop.f32.mrb[13].mxu0  ;;  %2556 = vmatprep.mubr.msk.bf16.mxu0 %vm763_vm1, %v3394_v24 }
 0x351   :  { %v736_v34 = vmul.f32 %v720_v6, %v708_v33  ;;  %v710_v35 = vpop.f32.mrb[14].mxu0  ;;  %2650 = vmatprep.subr.msk.bf16.mxu0 %vm763_vm1, %v3396_v28  ;;  %v771_v37 = vsel %vm763_vm1, %v3396_v28, 0 }
 0x352   :  { %v743_v39 = vadd.f32 %v735_v32, %v727_v59  ;;  %v737_v41 = vmul.f32 %v721_v8, %v710_v35  ;;  %v712_v44 = vpop.f32.mrb[15].mxu0  ;;  %2555 = vmatpush3.bf16.xpose.msra.mxu0 %v771_v37 }
 0x353   :  { %v744_v45 = vadd.f32 %v736_v34, %v728_v40  ;;  %v738_v46 = vmul.f32 %v722_v2, %v712_v44  ;;  %2578 = vmatprep.subr.bf16.mxu0 %v3009_v47 }
 0x354   :  { %v745_v48 = vadd.f32 %v737_v41, %v729_v62 }
 0x355   :  { %v746_v49 = vadd.f32 %v738_v46, %v730_v3 }
 0x356   :  { %v3407_v50 = vpack.c.bf16 %v745_v48, %v743_v39 }
 0x357   :  { %v3409_v51 = vpack.c.bf16 %v746_v49, %v744_v45 }
 0x3c2   :  { %v3416_v25 = vpop.permute.xlu0 %761 }
 0x3c3   :  { %2557 = vmatmul.mubr.msk.bf16.vlgmr.msra.gmra.mrb[16].mxu0 %vm763_vm1, %v3416_v25 }
 0x3c4   :  { %2579 = vmatpush3.bf16.msra.mxu0 %v3414_v52  ;;  %2586 = vmatprep.mubr.msk.bf16.mxu0 %vm3012_vm5, %v3009_v47 }
 0x3c5   :  { %2580 = vmatprep.subr.bf16.mxu0 %v3009_v47 }
 0x3c8   :  { %2581 = vmatpush3.bf16.msra.mxu0 %v3424_v53 }
 0x3c9   :  { %2582 = vmatprep.subr.bf16.mxu0 %v3009_v47 }
 0x3cc   :  { %2583 = vmatpush3.bf16.msra.mxu0 %v3431_v26 }
 0x3cd   :  { %2584 = vmatprep.subr.bf16.mxu0 %v3009_v47 }
 0x3d0   :  { %2585 = vmatpush3.bf16.msra.mxu0 %v3438_v54 }
 0x3d1   :  { %2652 = vmatprep.subr.msk.bf16.mxu0 %vm763_vm1, %v3409_v51 }
 0x496   :  { %v2558_v56 = vpop.f32.mrb[16].mxu0 }
 0x497   :  { %v816_v57 = vadd.f32 %v2558_v56, %v3448_v55  ;;  %v807_v58 = vpop.f32.mrb[17].mxu0 }
 0x498   :  { %v2559_v36 = vpop.f32.mrb[18].mxu0  ;;  %v808_v59 = vadd.f32 %v807_v58, %v3448_v55 }
 0x499   :  { %v810_v60 = vpop.f32.mrb[19].mxu0  ;;  %v829_v38 = vsel %vm822_vm3, %v816_v57, -inf  ;;  %v819_v61 = vadd.f32 %v2559_v36, %v3454_v9 }
 0x49a   :  { %830 = vmax.xlane.f32.xlu1 %v829_v38  ;;  %v811_v1 = vadd.f32 %v810_v60, %v3454_v9  ;;  %v823_v40 = vsel %vm822_vm3, %v808_v59, -inf }
 0x49b   :  { %v832_v62 = vsel %vm822_vm3, %v819_v61, -inf }
 0x49c   :  { %v826_v42 = vsel %vm822_vm3, %v811_v1, -inf }
 0x49e   :  { %824 = vmax.xlane.f32.xlu1 %v823_v40 }
 0x4a2   :  { %827 = vmax.xlane.f32.xlu1 %v826_v42 }
 0x4a6   :  { %833 = vmax.xlane.f32.xlu1 %v832_v62 }
 0x4b7   :  { %870 = vrot.lane.b32.xlu1 %v3288_v31, %s3010_s7 }
 0x527   :  { %v831_v63 = vpop.xlane.xlu1 %830 }
 0x528   :  { %v837_v3 = vsub.f32 %v816_v57, %v831_v63 }
 0x52a   :  { %v843_v4 = vmul.f32 1.442695, %v837_v3 }
 0x52b   :  { %v825_v6 = vpop.xlane.xlu1 %824 }
 0x52c   :  { %2875 = vpow2.f32 %v843_v4  ;;  %v835_v7 = vsub.f32 %v808_v59, %v825_v6 }
 0x52e   :  { %v839_v8 = vmul.f32 1.442695, %v835_v7 }
 0x52f   :  { %v828_v10 = vpop.xlane.xlu1 %827 }
 0x530   :  { %2877 = vpow2.f32 %v839_v8  ;;  %v836_v0 = vsub.f32 %v811_v1, %v828_v10 }
 0x532   :  { %v841_v12 = vmul.f32 1.442695, %v836_v0 }
 0x533   :  { %v834_v11 = vpop.xlane.xlu1 %833 }
 0x534   :  { %v838_v2 = vsub.f32 %v819_v61, %v834_v11 }
 0x536   :  { %v2876_v5 = vpop.eup %2875  ;;  %v845_v13 = vmul.f32 1.442695, %v838_v2 }
 0x537   :  { %v871_v14 = vpop.permute.xlu1 %870  ;;  %v853_v15 = vsel %vm822_vm3, %v2876_v5, 0.0 }
 0x538   :  { %2879 = vpow2.f32 %v845_v13  ;;  %854 = vadd.xlane.f32.xlu0 %v853_v15  ;;  %2560 = vmatprep.subr.bf16.mxu1 %v871_v14 }
 0x539   :  { %2561 = vmatpush3.bf16.msra.mxu1 %v871_v14  ;;  %2881 = vpow2.f32 %v841_v12 }
 0x53a   :  { %v2878_v16 = vpop.eup %2877 }
 0x53b   :  { %v847_v17 = vsel %vm822_vm3, %v2878_v16, 0.0 }
 0x53c   :  { %848 = vadd.xlane.f32.xlu1 %v847_v17 }
 0x542   :  { %v2880_v18 = vpop.eup %2879 }
 0x543   :  { %v856_v19 = vsel %vm822_vm3, %v2880_v18, 0.0  ;;  %v2882_v20 = vpop.eup %2881 }
 0x544   :  { %857 = vadd.xlane.f32.xlu1 %v856_v19  ;;  %v850_v21 = vsel %vm822_vm3, %v2882_v20, 0.0 }
 0x548   :  { %851 = vadd.xlane.f32.xlu1 %v850_v21 }
 0x54e   :  { %949 = vrot.lane.b32.xlu0 %v3416_v25, %s3010_s7 }
 0x559   :  { %952 = vrot.lane.b32.xlu1 %v3396_v28, %s3008_s2 }
 0x55d   :  { %947 = vrot.lane.b32.xlu1 %v3394_v24, %s3010_s7 }
 0x5c5   :  { %v855_v32 = vpop.xlane.xlu0 %854 }
 0x5c9   :  { %v849_v23 = vpop.xlane.xlu1 %848  ;;  %v950_v27 = vpop.permute.xlu0 %949 }
 0x5d1   :  { %v858_v29 = vpop.xlane.xlu1 %857 }
 0x5d2   :  { %2883 = vrcp.f32 %v858_v29 }
 0x5d3   :  { %2885 = vrcp.f32 %v849_v23 }
 0x5d4   :  { %2887 = vrcp.f32 %v855_v32 }
 0x5d5   :  { %v852_v33 = vpop.xlane.xlu1 %851 }
 0x5d6   :  { %2889 = vrcp.f32 %v852_v33 }
 0x5d9   :  { %v953_v34 = vpop.permute.xlu1 %952 }
 0x5da   :  { %2651 = vmatprep.subr.msk.bf16.mxu1 %vm763_vm1, %v953_v34  ;;  %v961_v49 = vsel %vm763_vm1, %v953_v34, 0 }
 0x5dc   :  { %v2884_v35 = vpop.eup %2883 }
 0x5dd   :  { %v2886_v37 = vpop.eup %2885  ;;  %v866_v44 = vmul.f32 %v2884_v35, %v2880_v18  ;;  %v948_v25 = vpop.permute.xlu1 %947 }
 0x5de   :  { %v2888_v39 = vpop.eup %2887  ;;  %v863_v28 = vmul.f32 %v2886_v37, %v2878_v16 }
 0x5df   :  { %v865_v46 = vmul.f32 %v2888_v39, %v2876_v5 }
 0x5e0   :  { %v2890_v41 = vpop.eup %2889 }
 0x5e1   :  { %v864_v45 = vmul.f32 %v2890_v41, %v2882_v20  ;;  %v868_v48 = vpack.c.bf16 %v866_v44, %v865_v46 }
 0x5e3   :  { %v867_v24 = vpack.c.bf16 %v864_v45, %v863_v28 }
 0x5e5   :  { %2562 = vmatprep.mubr.msk.bf16.mxu1 %vm822_vm3, %v867_v24 }
 0x5e6   :  { %2563 = vmatmul.mubr.msk.bf16.vlgmr.msra.gmra.mrb[8].mxu1 %vm822_vm3, %v868_v48 }
 0x5e7   :  { %2567 = vmatpush3.bf16.xpose.msra.mxu1 %v961_v49  ;;  %2568 = vmatprep.mubr.msk.bf16.mxu1 %vm763_vm1, %v948_v25 }
 0x5ee   :  { %2569 = vmatmul.mubr.msk.bf16.vlgmr.msra.gmra.mrb[12].mxu1 %vm763_vm1, %v950_v27  ;;  %v3515_v27 = vld [vmem:[%s3853_s8] sm:$0xff]  }
 0x6b9   :  { %v3479_v30 = vpop.f32.mrb[8].mxu1 }
 0x6ba   :  { %v3481_v56 = vpop.f32.mrb[9].mxu1 }
 0x6bb   :  { %v3483_v57 = vpop.f32.mrb[10].mxu1 }
 0x6bc   :  { %v2668_v58 = vpack.i.bf16 %v3483_v57, %v3479_v30  ;;  %v3487_v36 = vpop.f32.mrb[11].mxu1  ;;  %v1283_v30 = vsel %vm763_vm1, %v3409_v51, 0 }
 0x6c1   :  { %v2570_v59 = vpop.f32.mrb[12].mxu1 }
 0x6c2   :  { %v997_v60 = vpop.f32.mrb[13].mxu1  ;;  %v1006_v61 = vadd.f32 %v2570_v59, %v3448_v55 }
 0x6c3   :  { %v998_v38 = vadd.f32 %v997_v60, %v3448_v55  ;;  %v2571_v1 = vpop.f32.mrb[14].mxu1  ;;  %v3523_v60 = vld [vmem:[%s3853_s8 + $0x8] sm:$0xff]  }
 0x6c4   :  { %v1000_v40 = vpop.f32.mrb[15].mxu1  ;;  %v1009_v3 = vadd.f32 %v2571_v1, %v3454_v9  ;;  %v1018_v4 = vsel %vm822_vm3, %v1006_v61, -inf  ;;  %v3537_v1 = vld [vmem:[%s3853_s8 + $0x18] sm:$0xff]  }
 0x6c5   :  { %v1001_v42 = vadd.f32 %v1000_v40, %v3454_v9  ;;  %v1012_v62 = vsel %vm822_vm3, %v998_v38, -inf }
 0x6c6   :  { %1013 = vmax.xlane.f32.xlu1 %v1012_v62  ;;  %v1021_v6 = vsel %vm822_vm3, %v1009_v3, -inf }
 0x6c7   :  { %v1015_v63 = vsel %vm822_vm3, %v1001_v42, -inf }
 0x6c8   :  { %1016 = vmax.xlane.f32.xlu0 %v1015_v63 }
 0x6ca   :  { %1019 = vmax.xlane.f32.xlu1 %v1018_v4 }
 0x6ce   :  { %1022 = vmax.xlane.f32.xlu1 %v1021_v6 }
 0x753   :  { %v1014_v7 = vpop.xlane.xlu1 %1013 }
 0x754   :  { %v1024_v8 = vsub.f32 %v998_v38, %v1014_v7  ;;  %v3530_v38 = vld [vmem:[%s3853_s8 + $0x10] sm:$0xff]  }
 0x755   :  { %v1017_v10 = vpop.xlane.xlu0 %1016 }
 0x756   :  { %v1028_v2 = vmul.f32 1.442695, %v1024_v8  ;;  %v1025_v5 = vsub.f32 %v1001_v42, %v1017_v10 }
 0x757   :  { %v1020_v0 = vpop.xlane.xlu1 %1019 }
 0x758   :  { %v1026_v11 = vsub.f32 %v1006_v61, %v1020_v0  ;;  %v1030_v15 = vmul.f32 1.442695, %v1025_v5 }
 0x75a   :  { %v1032_v12 = vmul.f32 1.442695, %v1026_v11 }
 0x75b   :  { %v1023_v13 = vpop.xlane.xlu1 %1022 }
 0x75c   :  { %2891 = vpow2.f32 %v1032_v12  ;;  %v1027_v14 = vsub.f32 %v1009_v3, %v1023_v13 }
 0x75d   :  { %2893 = vpow2.f32 %v1028_v2 }
 0x75e   :  { %v1034_v16 = vmul.f32 1.442695, %v1027_v14 }
 0x760   :  { %2895 = vpow2.f32 %v1034_v16 }
 0x761   :  { %2897 = vpow2.f32 %v1030_v15 }
 0x766   :  { %v2892_v17 = vpop.eup %2891 }
 0x767   :  { %v1042_v18 = vsel %vm822_vm3, %v2892_v17, 0.0  ;;  %v2894_v19 = vpop.eup %2893 }
 0x768   :  { %1043 = vadd.xlane.f32.xlu1 %v1042_v18  ;;  %v1036_v21 = vsel %vm822_vm3, %v2894_v19, 0.0 }
 0x76a   :  { %v2896_v20 = vpop.eup %2895 }
 0x76b   :  { %v1045_v23 = vsel %vm822_vm3, %v2896_v20, 0.0  ;;  %v2898_v29 = vpop.eup %2897 }
 0x76c   :  { %1037 = vadd.xlane.f32.xlu1 %v1036_v21  ;;  %1046 = vadd.xlane.f32.xlu0 %v1045_v23  ;;  %v1039_v32 = vsel %vm822_vm3, %v2898_v29, 0.0 }
 0x770   :  { %1040 = vadd.xlane.f32.xlu1 %v1039_v32 }
 0x781   :  { %1058 = vrot.lane.b32.xlu1 %v3288_v31, %s3011_s24 }
 0x782   :  { %1274 = vrot.lane.b32.xlu0 %v3407_v50, %s3008_s2 }
 0x786   :  { %1455 = vrot.lane.b32.xlu0 %v3409_v51, %s3008_s2 }
 0x7f5   :  { %v1044_v33 = vpop.xlane.xlu1 %1043 }
 0x7f9   :  { %v1047_v34 = vpop.xlane.xlu0 %1046  ;;  %v1038_v35 = vpop.xlane.xlu1 %1037 }
 0x7fa   :  { %2899 = vrcp.f32 %v1047_v34 }
 0x7fb   :  { %2901 = vrcp.f32 %v1038_v35 }
 0x7fc   :  { %2903 = vrcp.f32 %v1044_v33 }
 0x7fd   :  { %v3507_v37 = vpop.permute.xlu0 %1274  ;;  %v1041_v39 = vpop.xlane.xlu1 %1040 }
 0x7fe   :  { %2905 = vrcp.f32 %v1041_v39  ;;  %1452 = vrot.lane.b32.xlu0 %v3507_v37, %s3010_s7 }
 0x801   :  { %v1059_v31 = vpop.permute.xlu1 %1058  ;;  %v1456_v40 = vpop.permute.xlu0 %1455 }
 0x802   :  { %2572 = vmatprep.subr.bf16.mxu1 %v1059_v31  ;;  %v1464_v13 = vsel %vm763_vm1, %v1456_v40, 0 }
 0x803   :  { %2573 = vmatpush3.bf16.msra.mxu1 %v1059_v31 }
 0x804   :  { %2590 = vmatprep.subr.bf16.mxu1 %v3009_v47  ;;  %v2900_v41 = vpop.eup %2899 }
 0x805   :  { %v2902_v44 = vpop.eup %2901  ;;  %v1055_v46 = vmul.f32 %v2900_v41, %v2896_v20 }
 0x806   :  { %v2904_v28 = vpop.eup %2903  ;;  %v1052_v24 = vmul.f32 %v2902_v44, %v2894_v19 }
 0x807   :  { %v1054_v49 = vmul.f32 %v2904_v28, %v2892_v17 }
 0x808   :  { %v2906_v45 = vpop.eup %2905 }
 0x809   :  { %v1053_v48 = vmul.f32 %v2906_v45, %v2898_v29  ;;  %v1057_v59 = vpack.c.bf16 %v1055_v46, %v1054_v49 }
 0x80b   :  { %v1056_v25 = vpack.c.bf16 %v1053_v48, %v1052_v24 }
 0x80d   :  { %2574 = vmatprep.mubr.msk.bf16.mxu1 %vm822_vm3, %v1056_v25 }
 0x80e   :  { %2575 = vmatmul.mubr.msk.bf16.vlgmr.msra.gmra.mrb[16].mxu1 %vm822_vm3, %v1057_v59 }
 0x80f   :  { %2591 = vmatpush3.bf16.msra.mxu1 %v3515_v27  ;;  %2598 = vmatprep.mubr.msk.bf16.mxu1 %vm3012_vm5, %v3009_v47 }
 0x810   :  { %2592 = vmatprep.subr.bf16.mxu1 %v3009_v47 }
 0x813   :  { %2593 = vmatpush3.bf16.msra.mxu1 %v3523_v60 }
 0x814   :  { %2594 = vmatprep.subr.bf16.mxu1 %v3009_v47 }
 0x817   :  { %2595 = vmatpush3.bf16.msra.mxu1 %v3530_v38 }
 0x818   :  { %2596 = vmatprep.subr.bf16.mxu1 %v3009_v47 }
 0x81b   :  { %2597 = vmatpush3.bf16.msra.mxu1 %v3537_v1 }
 0x81c   :  { %2653 = vmatprep.subr.msk.bf16.mxu1 %vm763_vm1, %v1456_v40 }
 0x870   :  { %v1453_v51 = vpop.permute.xlu0 %1452 }
 0x8e1   :  { %v2576_v61 = vpop.f32.mrb[16].mxu1 }
 0x8e2   :  { %v1101_v42 = vpop.f32.mrb[17].mxu1 }
 0x8e3   :  { %v2577_v62 = vpop.f32.mrb[18].mxu1 }
 0x8e4   :  { %v2663_v63 = vpack.i.bf16 %v2577_v62, %v2576_v61  ;;  %v1104_v3 = vpop.f32.mrb[19].mxu1 }
 0x8e6   :  { %2664 = vrot.lane.b32.xlu1 %v2663_v63, %s3011_s24 }
 0x8ea   :  { %2669 = vrot.lane.b32.xlu1 %v2668_v58, %s3011_s24 }
 0x8ee   :  { %1450 = vrot.lane.b32.xlu1 %v3407_v50, %s3010_s7 }
 0x958   :  { %v2665_v4 = vpop.permute.xlu1 %2664 }
 0x959   :  { %v2667_v6 = vunpack.i.h.bf16 %v2665_v4  ;;  %v2666_v7 = vunpack.i.l.bf16 %v2665_v4 }
 0x95b   :  { %v1124_v8 = vsel %vm763_vm1, %v1101_v42, %v2666_v7  ;;  %v1125_v10 = vsel %vm763_vm1, %v1104_v3, %v2667_v6 }
 0x95c   :  { %v1134_v0 = vpack.c.bf16 %v1125_v10, %v1124_v8  ;;  %v2670_v11 = vpop.permute.xlu1 %2669 }
 0x95d   :  { %v2672_v2 = vunpack.i.h.bf16 %v2670_v11  ;;  %v2671_v5 = vunpack.i.l.bf16 %v2670_v11 }
 0x95e   :  { %2587 = vmatmul.mubr.msk.bf16.vlgmr.msra.gmra.mrb[20].mxu0 %vm396_vm0, %v1134_v0 }
 0x95f   :  { %v937_v57 = vsel %vm763_vm1, %v3487_v36, %v2672_v2  ;;  %v936_v58 = vsel %vm763_vm1, %v3481_v56, %v2671_v5  ;;  %2603 = vmatpush3.bf16.xpose.msra.mxu0 %v1283_v30  ;;  %2604 = vmatprep.mubr.msk.bf16.mxu0 %vm763_vm1, %v3407_v50 }
 0x960   :  { %v946_v12 = vpack.c.bf16 %v937_v57, %v936_v58  ;;  %v1451_v14 = vpop.permute.xlu1 %1450 }
 0x962   :  { %2599 = vmatmul.mubr.msk.bf16.vlgmr.msra.gmra.mrb[20].mxu1 %vm396_vm0, %v946_v12 }
 0x963   :  { %2615 = vmatpush3.bf16.xpose.msra.mxu1 %v1464_v13  ;;  %2616 = vmatprep.mubr.msk.bf16.mxu1 %vm763_vm1, %v1451_v14 }
 0x964   :  { %2626 = vmatprep.subr.bf16.mxu1 %v3009_v47 }
 0x966   :  { %2605 = vmatmul.mubr.msk.bf16.vlgmr.msra.gmra.mrb[24].mxu0 %vm763_vm1, %v3507_v37 }
 0x96a   :  { %2617 = vmatmul.mubr.msk.bf16.vlgmr.msra.gmra.mrb[24].mxu1 %vm763_vm1, %v1453_v51 }
 0x96b   :  { %2627 = vmatpush3.bf16.msra.mxu1 %v3414_v52  ;;  %2634 = vmatprep.mubr.msk.bf16.mxu1 %vm3012_vm5, %v3009_v47 }
 0x96c   :  { %2628 = vmatprep.subr.bf16.mxu1 %v3009_v47 }
 0x96f   :  { %2629 = vmatpush3.bf16.msra.mxu1 %v3424_v53 }
 0x970   :  { %2630 = vmatprep.subr.bf16.mxu1 %v3009_v47 }
 0x973   :  { %2631 = vmatpush3.bf16.msra.mxu1 %v3431_v26 }
 0x974   :  { %2632 = vmatprep.subr.bf16.mxu1 %v3009_v47 }
 0x977   :  { %2633 = vmatpush3.bf16.msra.mxu1 %v3438_v54 }
 0xa31   :  { %v1196_v50 = vpop.f32.mrb[20].mxu0 }
 0xa32   :  { %v2588_v56 = vpop.f32.mrb[21].mxu0 }
 0xa33   :  { %v1199_v36 = vpop.f32.mrb[22].mxu0 }
 0xa34   :  { %v2589_v15 = vpop.f32.mrb[23].mxu0 }
 0xa35   :  { %v1264_v52 = vpop.f32.mrb[20].mxu1 }
 0xa36   :  { %v3580_v16 = vadd.f32 %v1264_v52, %v1196_v50  ;;  %v2600_v17 = vpop.f32.mrb[21].mxu1 }
 0xa37   :  { %v1267_v18 = vpop.f32.mrb[22].mxu1 }
 0xa38   :  { %v3582_v19 = vadd.f32 %v1267_v18, %v1199_v36  ;;  %v2601_v53 = vpop.f32.mrb[23].mxu1 }
 0xa39   :  { %v2606_v20 = vpop.f32.mrb[24].mxu0 }
 0xa3a   :  { %v1319_v21 = vpop.f32.mrb[25].mxu0  ;;  %v1328_v37 = vadd.f32 %v2606_v20, %v3448_v55 }
 0xa3b   :  { %v1320_v26 = vadd.f32 %v1319_v21, %v3448_v55  ;;  %v2607_v23 = vpop.f32.mrb[26].mxu0 }
 0xa3c   :  { %v1322_v29 = vpop.f32.mrb[27].mxu0  ;;  %v1331_v54 = vadd.f32 %v2607_v23, %v3454_v9  ;;  %v1340_v46 = vsel %vm822_vm3, %v1328_v37, -inf }
 0xa3d   :  { %v1323_v32 = vadd.f32 %v1322_v29, %v3454_v9  ;;  %v2618_v33 = vpop.f32.mrb[24].mxu1  ;;  %v1334_v34 = vsel %vm822_vm3, %v1320_v26, -inf }
 0xa3e   :  { %v1500_v35 = vpop.f32.mrb[25].mxu1  ;;  %1335 = vmax.xlane.f32.xlu1 %v1334_v34  ;;  %v1343_v28 = vsel %vm822_vm3, %v1331_v54, -inf  ;;  %v1509_v49 = vadd.f32 %v2618_v33, %v3448_v55 }
 0xa3f   :  { %v2619_v39 = vpop.f32.mrb[26].mxu1  ;;  %v1337_v31 = vsel %vm822_vm3, %v1323_v32, -inf  ;;  %v1501_v45 = vadd.f32 %v1500_v35, %v3448_v55 }
 0xa40   :  { %v1503_v41 = vpop.f32.mrb[27].mxu1  ;;  %1338 = vmax.xlane.f32.xlu0 %v1337_v31  ;;  %v1512_v24 = vadd.f32 %v2619_v39, %v3454_v9  ;;  %v1521_v40 = vsel %vm822_vm3, %v1509_v49, -inf }
 0xa41   :  { %v1504_v44 = vadd.f32 %v1503_v41, %v3454_v9  ;;  %v1515_v25 = vsel %vm822_vm3, %v1501_v45, -inf }
 0xa42   :  { %1344 = vmax.xlane.f32.xlu1 %v1343_v28  ;;  %v1524_v59 = vsel %vm822_vm3, %v1512_v24, -inf }
 0xa43   :  { %v1518_v48 = vsel %vm822_vm3, %v1504_v44, -inf }
 0xa44   :  { %1341 = vmax.xlane.f32.xlu0 %v1340_v46 }
 0xa46   :  { %1519 = vmax.xlane.f32.xlu1 %v1518_v48 }
 0xa48   :  { %1516 = vmax.xlane.f32.xlu0 %v1515_v25 }
 0xa4a   :  { %1525 = vmax.xlane.f32.xlu1 %v1524_v59 }
 0xa4c   :  { %1522 = vmax.xlane.f32.xlu0 %v1521_v40 }
 0xacb   :  { %v1336_v61 = vpop.xlane.xlu1 %1335 }
 0xacc   :  { %v1346_v12 = vsub.f32 %v1320_v26, %v1336_v61 }
 0xacd   :  { %v1339_v42 = vpop.xlane.xlu0 %1338 }
 0xace   :  { %v1347_v30 = vsub.f32 %v1323_v32, %v1339_v42  ;;  %v1350_v50 = vmul.f32 1.442695, %v1346_v12 }
 0xacf   :  { %v1345_v62 = vpop.xlane.xlu1 %1344 }
 0xad0   :  { %v1349_v4 = vsub.f32 %v1331_v54, %v1345_v62  ;;  %v1352_v51 = vmul.f32 1.442695, %v1347_v30 }
 0xad1   :  { %v1342_v63 = vpop.xlane.xlu0 %1341 }
 0xad2   :  { %v1348_v10 = vsub.f32 %v1328_v37, %v1342_v63  ;;  %v1356_v2 = vmul.f32 1.442695, %v1349_v4 }
 0xad3   :  { %v1520_v3 = vpop.xlane.xlu1 %1519 }
 0xad4   :  { %v1528_v9 = vsub.f32 %v1504_v44, %v1520_v3  ;;  %v1354_v13 = vmul.f32 1.442695, %v1348_v10 }
 0xad5   :  { %v1517_v6 = vpop.xlane.xlu0 %1516 }
 0xad6   :  { %v1533_v7 = vmul.f32 1.442695, %v1528_v9  ;;  %v1527_v8 = vsub.f32 %v1501_v45, %v1517_v6 }
 0xad7   :  { %v1526_v55 = vpop.xlane.xlu1 %1525 }
 0xad8   :  { %2907 = vpow2.f32 %v1533_v7  ;;  %v1531_v0 = vmul.f32 1.442695, %v1527_v8  ;;  %v1530_v11 = vsub.f32 %v1512_v24, %v1526_v55 }
 0xad9   :  { %v1523_v5 = vpop.xlane.xlu0 %1522 }
 0xada   :  { %2909 = vpow2.f32 %v1531_v0  ;;  %v1537_v57 = vmul.f32 1.442695, %v1530_v11  ;;  %v1529_v58 = vsub.f32 %v1509_v49, %v1523_v5 }
 0xadc   :  { %2911 = vpow2.f32 %v1537_v57  ;;  %v1535_v14 = vmul.f32 1.442695, %v1529_v58  ;;  %v2789_v58 = vld [vmem:[%s3855_s10 + $0x4] ss:$16 sps:$4 sm:$0xff]  }
 0xadd   :  { %2913 = vpow2.f32 %v1356_v2  ;;  %1953 = vmatprep.subr.bf16.mxu1 %v2789_v58 }
 0xade   :  { %2915 = vpow2.f32 %v1535_v14  ;;  %v2979_v14 = vld [vmem:[%s3845_s0] sm:$0xff] }
 0xadf   :  { %2917 = vpow2.f32 %v1354_v13 }
 0xae0   :  { %2919 = vpow2.f32 %v1352_v51  ;;  %v3642_v51 = vadd.f32 %v2979_v14, %v3580_v16 }
 0xae1   :  { %2921 = vpow2.f32 %v1350_v50  ;;  %v2980_v50 = vld [vmem:[%s3845_s0 + $0x8] sm:$0xff] }
 0xae2   :  { %v2908_v56 = vpop.eup %2907 }
 0xae3   :  { %v1542_v36 = vsel %vm822_vm3, %v2908_v56, 0.0 }
 0xae4   :  { %v2910_v15 = vpop.eup %2909  ;;  %1543 = vadd.xlane.f32.xlu1 %v1542_v36  ;;  %v1721_v36 = vmul.f32 %v3642_v51, %v3642_v51 }
 0xae5   :  { %v1539_v52 = vsel %vm822_vm3, %v2910_v15, 0.0 }
 0xae6   :  { %v3602_v17 = vpop.eup %2911  ;;  %1540 = vadd.xlane.f32.xlu0 %v1539_v52 }
 0xae7   :  { %v2914_v18 = vpop.eup %2913  ;;  %v1548_v53 = vsel %vm822_vm3, %v3602_v17, 0.0 }
 0xae8   :  { %v2916_v20 = vpop.eup %2915  ;;  %1549 = vadd.xlane.f32.xlu1 %v1548_v53  ;;  %v1367_v23 = vsel %vm822_vm3, %v2914_v18, 0.0 }
 0xae9   :  { %v1545_v21 = vsel %vm822_vm3, %v2916_v20, 0.0  ;;  %v2918_v26 = vpop.eup %2917 }
 0xaea   :  { %1546 = vadd.xlane.f32.xlu0 %v1545_v21  ;;  %v2920_v29 = vpop.eup %2919  ;;  %v1364_v54 = vsel %vm822_vm3, %v2918_v26, 0.0  ;;  %v2798_v21 = vld [vmem:[%s3855_s10 + $0x2c] ss:$16 sps:$4 sm:$0xff]  }
 0xaeb   :  { %v2922_v32 = vpop.eup %2921  ;;  %v1361_v33 = vsel %vm822_vm3, %v2920_v29, 0.0 }
 0xaec   :  { %1368 = vadd.xlane.f32.xlu1 %v1367_v23  ;;  %v1358_v34 = vsel %vm822_vm3, %v2922_v32, 0.0 }
 0xaee   :  { %1365 = vadd.xlane.f32.xlu0 %v1364_v54 }
 0xaf0   :  { %1362 = vadd.xlane.f32.xlu1 %v1361_v33 }
 0xaf2   :  { %1359 = vadd.xlane.f32.xlu0 %v1358_v34 }
 0xb01   :  { %1561 = vrot.lane.b32.xlu1 %v3311_v43, %s3011_s24 }
 0xb08   :  { %1381 = vrot.lane.b32.xlu0 %v3311_v43, %s3010_s7 }
 0xb71   :  { %v1544_v35 = vpop.xlane.xlu1 %1543 }
 0xb72   :  { %2923 = vrcp.f32 %v1544_v35  ;;  %v2787_v35 = vld [vmem:[%s3855_s10] ss:$16 sps:$4 sm:$0xff]  }
 0xb73   :  { %v1541_v37 = vpop.xlane.xlu0 %1540 }
 0xb74   :  { %2925 = vrcp.f32 %v1541_v37  ;;  %v2802_v37 = vld [vmem:[%s3855_s10 + $0x48] ss:$16 sps:$4 sm:$0xff]  }
 0xb75   :  { %v1550_v39 = vpop.xlane.xlu1 %1549 }
 0xb77   :  { %v1547_v31 = vpop.xlane.xlu0 %1546 }
 0xb79   :  { %v1369_v41 = vpop.xlane.xlu1 %1368 }
 0xb7b   :  { %v1366_v44 = vpop.xlane.xlu0 %1365 }
 0xb7c   :  { %2927 = vrcp.f32 %v1366_v44  ;;  %v2924_v24 = vpop.eup %2923  ;;  %v2793_v44 = vld [vmem:[%s3855_s10 + $0x20] ss:$16 sps:$4 sm:$0xff]  }
 0xb7d   :  { %v1363_v28 = vpop.xlane.xlu1 %1362  ;;  %v1556_v4 = vmul.f32 %v2924_v24, %v2908_v56  ;;  %v3648_v56 = vadd.f32 %v2980_v50, %v3582_v19  ;;  %v2790_v19 = vld [vmem:[%s3855_s10 + $0x8] ss:$16 sps:$4 sm:$0xff]   ;;  %v2799_v24 = vld [vmem:[%s3855_s10 + $0x40] ss:$16 sps:$4 sm:$0xff]  }
 0xb7e   :  { %2929 = vrcp.f32 %v1363_v28  ;;  %v2926_v43 = vpop.eup %2925  ;;  %v2808_v28 = vld [vmem:[%s3855_s10 + $0x68] ss:$16 sps:$4 sm:$0xff]  }
 0xb7f   :  { %2931 = vrcp.f32 %v1369_v41  ;;  %v1360_v45 = vpop.xlane.xlu0 %1359  ;;  %v1555_v63 = vmul.f32 %v2926_v43, %v2910_v15  ;;  %v1722_v15 = vmul.f32 %v3648_v56, %v3648_v56  ;;  %v2810_v41 = vld [vmem:[%s3855_s10 + $0x6c] ss:$16 sps:$4 sm:$0xff]   ;;  %v2807_v43 = vld [vmem:[%s3855_s10 + $0x64] ss:$16 sps:$4 sm:$0xff]  }
 0xb80   :  { %2933 = vrcp.f32 %v1360_v45  ;;  %v2801_v45 = vld [vmem:[%s3855_s10 + $0x44] ss:$16 sps:$4 sm:$0xff]  }
 0xb81   :  { %2935 = vrcp.f32 %v1547_v31  ;;  %v1562_v48 = vpop.permute.xlu1 %1561  ;;  %v1559_v8 = vpack.c.bf16 %v1556_v4, %v1555_v63  ;;  %v2795_v31 = vld [vmem:[%s3855_s10 + $0x24] ss:$16 sps:$4 sm:$0xff]   ;;  %v2832_v4 = vld [vmem:[%s3855_s10 + $0xe8] ss:$16 sps:$4 sm:$0xff]  }
 0xb82   :  { %2937 = vrcp.f32 %v1550_v39  ;;  %v2819_v63 = vld [vmem:[%s3855_s10 + $0xa4] ss:$16 sps:$4 sm:$0xff]  }
 0xb83   :  { %v1382_v46 = vpop.permute.xlu0 %1381 }
 0xb84   :  { %2608 = vmatprep.subr.bf16.mxu0 %v1382_v46 }
 0xb85   :  { %2609 = vmatpush3.bf16.msra.mxu0 %v1382_v46  ;;  %v2816_v46 = vld [vmem:[%s3855_s10 + $0x8c] ss:$16 sps:$4 sm:$0xff]  }
 0xb86   :  { %2620 = vmatprep.subr.bf16.mxu0 %v1562_v48  ;;  %v2928_v49 = vpop.eup %2927 }
 0xb87   :  { %v1376_v61 = vmul.f32 %v2928_v49, %v2918_v26  ;;  %v2796_v26 = vld [vmem:[%s3855_s10 + $0x28] ss:$16 sps:$4 sm:$0xff]   ;;  %v2822_v49 = vld [vmem:[%s3855_s10 + $0xac] ss:$16 sps:$4 sm:$0xff]  }
 0xb88   :  { %v2930_v25 = vpop.eup %2929 }
 0xb89   :  { %v2932_v59 = vpop.eup %2931  ;;  %v1375_v62 = vmul.f32 %v2930_v25, %v2920_v29  ;;  %v2804_v29 = vld [vmem:[%s3855_s10 + $0x4c] ss:$16 sps:$4 sm:$0xff]   ;;  %v2805_v25 = vld [vmem:[%s3855_s10 + $0x60] ss:$16 sps:$4 sm:$0xff]  }
 0xb8a   :  { %v2934_v40 = vpop.eup %2933  ;;  %v1377_v3 = vmul.f32 %v2932_v59, %v2914_v18  ;;  %v2820_v59 = vld [vmem:[%s3855_s10 + $0xa8] ss:$16 sps:$4 sm:$0xff]  }
 0xb8b   :  { %v1374_v42 = vmul.f32 %v2934_v40, %v2922_v32  ;;  %v2936_v7 = vpop.eup %2935  ;;  %v2813_v40 = vld [vmem:[%s3855_s10 + $0x84] ss:$16 sps:$4 sm:$0xff]  }
 0xb8c   :  { %v1379_v6 = vpack.c.bf16 %v1377_v3, %v1376_v61  ;;  %v2938_v55 = vpop.eup %2937  ;;  %v1557_v10 = vmul.f32 %v2936_v7, %v2916_v20  ;;  %v2828_v61 = vld [vmem:[%s3855_s10 + $0xcc] ss:$16 sps:$4 sm:$0xff]   ;;  %v2823_v7 = vld [vmem:[%s3855_s10 + $0xc0] ss:$16 sps:$4 sm:$0xff]  }
 0xb8d   :  { %v1378_v9 = vpack.c.bf16 %v1375_v62, %v1374_v42  ;;  %v1558_v0 = vmul.f32 %v2938_v55, %v3602_v17  ;;  %v2811_v42 = vld [vmem:[%s3855_s10 + $0x80] ss:$16 sps:$4 sm:$0xff]   ;;  %v2826_v62 = vld [vmem:[%s3855_s10 + $0xc8] ss:$16 sps:$4 sm:$0xff]   ;;  %v2834_v3 = vld [vmem:[%s3855_s10 + $0xec] ss:$16 sps:$4 sm:$0xff]  }
 0xb8e   :  { %v2829_v55 = vld [vmem:[%s3855_s10 + $0xe0] ss:$16 sps:$4 sm:$0xff]  }
 0xb8f   :  { %2610 = vmatprep.mubr.msk.bf16.mxu0 %vm822_vm3, %v1378_v9  ;;  %v1560_v11 = vpack.c.bf16 %v1558_v0, %v1557_v10  ;;  %v2817_v9 = vld [vmem:[%s3855_s10 + $0xa0] ss:$16 sps:$4 sm:$0xff]  }
 0xb90   :  { %2611 = vmatmul.mubr.msk.bf16.vlgmr.msra.gmra.mrb[28].mxu0 %vm822_vm3, %v1379_v6  ;;  %v2825_v6 = vld [vmem:[%s3855_s10 + $0xc4] ss:$16 sps:$4 sm:$0xff]  }
 0xb91   :  { %2621 = vmatpush3.bf16.msra.mxu0 %v1562_v48  ;;  %2622 = vmatprep.mubr.msk.bf16.mxu0 %vm822_vm3, %v1559_v8  ;;  %v2814_v48 = vld [vmem:[%s3855_s10 + $0x88] ss:$16 sps:$4 sm:$0xff]   ;;  %v2831_v8 = vld [vmem:[%s3855_s10 + $0xe4] ss:$16 sps:$4 sm:$0xff]  }
 0xb92   :  { %2638 = vmatprep.subr.bf16.mxu0 %v3009_v47 }
 0xb98   :  { %2623 = vmatmul.mubr.msk.bf16.vlgmr.msra.gmra.mrb[32].mxu0 %vm822_vm3, %v1560_v11 }
 0xb99   :  { %2639 = vmatpush3.bf16.msra.mxu0 %v3515_v27  ;;  %2646 = vmatprep.mubr.msk.bf16.mxu0 %vm3012_vm5, %v3009_v47 }
 0xb9a   :  { %2640 = vmatprep.subr.bf16.mxu0 %v3009_v47 }
 0xb9d   :  { %2641 = vmatpush3.bf16.msra.mxu0 %v3523_v60  ;;  %v2792_v60 = vld [vmem:[%s3855_s10 + $0xc] ss:$16 sps:$4 sm:$0xff]  }
 0xb9e   :  { %2642 = vmatprep.subr.bf16.mxu0 %v3009_v47 }
 0xba1   :  { %2643 = vmatpush3.bf16.msra.mxu0 %v3530_v38 }
 0xba2   :  { %2644 = vmatprep.subr.bf16.mxu0 %v3009_v47 }
 0xba5   :  { %2645 = vmatpush3.bf16.msra.mxu0 %v3537_v1 }
 0xba6   :  { %2006 = vmatprep.subr.bf16.mxu0 %v2792_v60  ;;  %v3756_v60 = vld [vmem:[%s3854_s9] ss:$0 sm:$0xff] }
 0xc63   :  { %v2612_v2 = vpop.f32.mrb[28].mxu0 }
 0xc64   :  { %v1424_v5 = vpop.f32.mrb[29].mxu0 }
 0xc65   :  { %v2613_v30 = vpop.f32.mrb[30].mxu0 }
 0xc66   :  { %v2673_v57 = vpack.i.bf16 %v2613_v30, %v2612_v2  ;;  %v1427_v27 = vpop.f32.mrb[31].mxu0 }
 0xc68   :  { %2674 = vrot.lane.b32.xlu1 %v2673_v57, %s3011_s24 }
 0xc6b   :  { %v2624_v38 = vpop.f32.mrb[32].mxu0 }
 0xc6c   :  { %v1604_v47 = vpop.f32.mrb[33].mxu0 }
 0xc6d   :  { %v2625_v1 = vpop.f32.mrb[34].mxu0 }
 0xc6e   :  { %v2678_v12 = vpack.i.bf16 %v2625_v1, %v2624_v38  ;;  %v1607_v13 = vpop.f32.mrb[35].mxu0 }
 0xc70   :  { %2679 = vrot.lane.b32.xlu0 %v2678_v12, %s3011_s24 }
 0xc8c   :  { %1725 = vadd.xlane.f32.xlu1 %v1721_v36 }
 0xc8f   :  { %1727 = vadd.xlane.f32.xlu0 %v1722_v15 }
 0xcda   :  { %v2675_v52 = vpop.permute.xlu1 %2674 }
 0xcdb   :  { %v2677_v17 = vunpack.i.h.bf16 %v2675_v52  ;;  %v2676_v18 = vunpack.i.l.bf16 %v2675_v52 }
 0xcdd   :  { %v1447_v16 = vsel %vm763_vm1, %v1424_v5, %v2676_v18  ;;  %v1448_v53 = vsel %vm763_vm1, %v1427_v27, %v2677_v17 }
 0xcde   :  { %v1449_v20 = vpack.c.bf16 %v1448_v53, %v1447_v16  ;;  %v2981_v53 = vld [vmem:[%s3845_s0 + $0x10] sm:$0xff] }
 0xce0   :  { %2647 = vmatmul.mubr.msk.bf16.vlgmr.msra.gmra.mrb[36].mxu0 %vm396_vm0, %v1449_v20 }
 0xce1   :  { %2007 = vmatpush1.bf16.msra.mxu0 %v2790_v19  ;;  %2038 = vmatprep.mubr.bf16.mxu0 %v3007_v22 }
 0xce2   :  { %v2680_v23 = vpop.permute.xlu0 %2679  ;;  %2008 = vmatprep.subr.bf16.mxu0 %v2798_v21  ;;  %v2982_v21 = vld [vmem:[%s3845_s0 + $0x18] sm:$0xff] }
 0xce3   :  { %v2682_v54 = vunpack.i.h.bf16 %v2680_v23  ;;  %v2681_v32 = vunpack.i.l.bf16 %v2680_v23 }
 0xce5   :  { %v1627_v33 = vsel %vm763_vm1, %v1604_v47, %v2681_v32  ;;  %v1628_v34 = vsel %vm763_vm1, %v1607_v13, %v2682_v54  ;;  %2009 = vmatpush1.bf16.msra.mxu0 %v2796_v26  ;;  %v2835_v13 = vld [vmem:[%s3856_s11 + $0x40] sm:$0xff]   ;;  %v2837_v32 = vld [vmem:[%s3856_s11 + $0x48] sm:$0xff]  }
 0xce6   :  { %v1629_v39 = vpack.c.bf16 %v1628_v34, %v1627_v33  ;;  %2010 = vmatprep.subr.bf16.mxu0 %v2804_v29  ;;  %v2836_v54 = vld [vmem:[%s3856_s11] sm:$0xff]   ;;  %v2838_v33 = vld [vmem:[%s3856_s11 + $0x8] sm:$0xff]   ;;  %v2839_v34 = vld [vmem:[%s3856_s11 + $0x50] sm:$0xff]  }
 0xce8   :  { %2635 = vmatmul.mubr.msk.bf16.vlgmr.msra.gmra.mrb[28].mxu1 %vm396_vm0, %v1629_v39  ;;  %v2842_v39 = vld [vmem:[%s3856_s11 + $0x18] sm:$0xff]  }
 0xce9   :  { %1954 = vmatpush1.bf16.msra.mxu1 %v2787_v35  ;;  %2011 = vmatpush1.bf16.msra.mxu0 %v2802_v37  ;;  %v2840_v35 = vld [vmem:[%s3856_s11 + $0x10] sm:$0xff]   ;;  %v2841_v37 = vld [vmem:[%s3856_s11 + $0x58] sm:$0xff]  }
 0xcea   :  { %1955 = vmatprep.subr.bf16.mxu1 %v2795_v31  ;;  %2012 = vmatprep.subr.bf16.mxu0 %v2810_v41  ;;  %v2843_v31 = vld [vmem:[%s3856_s11 + $0x60] sm:$0xff]  }
 0xceb   :  { %1985 = vmatprep.mubr.bf16.mxu1 %v3007_v22  ;;  %v2844_v41 = vld [vmem:[%s3856_s11 + $0x20] sm:$0xff]  }
 0xced   :  { %1956 = vmatpush1.bf16.msra.mxu1 %v2793_v44  ;;  %2013 = vmatpush1.bf16.msra.mxu0 %v2808_v28  ;;  %v2845_v44 = vld [vmem:[%s3856_s11 + $0x68] sm:$0xff]  }
 0xcee   :  { %1957 = vmatprep.subr.bf16.mxu1 %v2801_v45  ;;  %2014 = vmatprep.subr.bf16.mxu0 %v2816_v46  ;;  %v2846_v28 = vld [vmem:[%s3856_s11 + $0x28] sm:$0xff]   ;;  %v2847_v45 = vld [vmem:[%s3856_s11 + $0x70] sm:$0xff]  }
 0xcef   :  { %v2848_v46 = vld [vmem:[%s3856_s11 + $0x30] sm:$0xff]  }
 0xcf1   :  { %1958 = vmatpush1.bf16.msra.mxu1 %v2799_v24  ;;  %2015 = vmatpush1.bf16.msra.mxu0 %v2814_v48  ;;  %v2849_v24 = vld [vmem:[%s3856_s11 + $0x78] sm:$0xff]  }
 0xcf2   :  { %1959 = vmatprep.subr.bf16.mxu1 %v2807_v43  ;;  %2016 = vmatprep.subr.bf16.mxu0 %v2822_v49  ;;  %v2850_v48 = vld [vmem:[%s3856_s11 + $0x38] sm:$0xff]   ;;  %s3013_s11 = smov [#allocation2]  }
 0xcf3   :  { %s2317_s29 = sshll.u32 %s3013_s11, 4  ;;  %s2318_s29 = int_to_ptr.vmem [resolvable:$true] %s2317_s29 }
 0xcf4   :  { %s2983_s30 = scalar_lea.vmem %s2318_s29, 512  ;;  %p2988_p1 = scmp.lt.s32.totalorder %s2318_s29, %s2318_s29 }
 0xcf5   :  { %1960 = vmatpush1.bf16.msra.mxu1 %v2805_v25  ;;  %2017 = vmatpush1.bf16.msra.mxu0 %v2820_v59  ;;  %p2984_p0 = scmp.ne.s32.totalorder %s2318_s29, %s2983_s30  ;;  %p2989_p2 = scmp.lt.s32.totalorder %s2983_s30, %s2983_s30 }
 0xcf6   :  { %1961 = vmatprep.subr.bf16.mxu1 %v2813_v40  ;;  %2018 = vmatprep.subr.bf16.mxu0 %v2828_v61 }
 0xcf7   :  { %p2990_p3 = por %p2989_p2, %p2988_p1 }
 0xcf9   :  { %1962 = vmatpush1.bf16.msra.mxu1 %v2811_v42  ;;  %2019 = vmatpush1.bf16.msra.mxu0 %v2826_v62  ;;  %p2991_p4 = pnand %p2990_p3, %p2984_p0 }
 0xcfa   :  { %1963 = vmatprep.subr.bf16.mxu1 %v2819_v63  ;;  %2020 = vmatprep.subr.bf16.mxu0 %v2834_v3 }
 0xcfd   :  { %1964 = vmatpush1.bf16.msra.mxu1 %v2817_v9  ;;  %2021 = vmatpush1.bf16.msra.mxu0 %v2832_v4 }
 0xcfe   :  { %1965 = vmatprep.subr.bf16.mxu1 %v2825_v6 }
 0xd01   :  { %1966 = vmatpush1.bf16.msra.mxu1 %v2823_v7 }
 0xd02   :  { %1967 = vmatprep.subr.bf16.mxu1 %v2831_v8 }
 0xd05   :  { %1968 = vmatpush1.bf16.msra.mxu1 %v2829_v55 }
 0xd06   :  { %2526 = vmatprep.subr.bf16.mxu1 %v2835_v13 }
 0xd19   :  { %v1726_v10 = vpop.xlane.xlu1 %1725 }
 0xd1a   :  { %v1733_v0 = vmul.f32 0.0078125, %v1726_v10 }
 0xd1c   :  { %v1737_v11 = vadd.f32 1e-06, %v1733_v0  ;;  %v1728_v2 = vpop.xlane.xlu0 %1727 }
 0xd1d   :  { %v1734_v5 = vmul.f32 0.0078125, %v1728_v2 }
 0xd1e   :  { %2939 = vrsqrt.f32 %v1737_v11 }
 0xd1f   :  { %v1738_v30 = vadd.f32 1e-06, %v1734_v5 }
 0xd21   :  { %2941 = vrsqrt.f32 %v1738_v30 }
 0xd28   :  { %v2940_v57 = vpop.eup %2939 }
 0xd29   :  { %v1745_v27 = vmul.f32 %v2940_v57, %v3642_v51 }
 0xd2b   :  { %v2942_v58 = vpop.eup %2941  ;;  %v1755_v47 = vmul.f32 %v3756_v60, %v1745_v27 }
 0xd2c   :  { %v1746_v38 = vmul.f32 %v2942_v58, %v3648_v56 }
 0xd2e   :  { %v1756_v1 = vmul.f32 %v3756_v60, %v1746_v38 }
 0xd30   :  { %v1759_v12 = vpack.c.bf16 %v1756_v1, %v1755_v47 }
 0xd32   :  { %1986 = vmatmul.mubr.bf16.vlgmr.msra.gmra.mrb[32].mxu1 %v1759_v12  ;;  %2039 = vmatmul.mubr.bf16.vlgmr.msra.gmra.mrb[40].mxu0 %v1759_v12 }
 0xd33   :  { %1995 = vmatprep.mubr.bf16.mxu1 %v3007_v22  ;;  %2048 = vmatprep.mubr.bf16.mxu0 %v3007_v22 }
 0xd34   :  { %2527 = vmatpush3.bf16.msra.mxu1 %v2836_v54 }
 0xd35   :  { %2528 = vmatprep.subr.bf16.mxu1 %v2837_v32 }
 0xd38   :  { %2529 = vmatpush3.bf16.msra.mxu1 %v2838_v33 }
 0xd39   :  { %2530 = vmatprep.subr.bf16.mxu1 %v2839_v34 }
 0xd3c   :  { %2531 = vmatpush3.bf16.msra.mxu1 %v2840_v35 }
 0xd3d   :  { %2532 = vmatprep.subr.bf16.mxu1 %v2841_v37 }
 0xd40   :  { %2533 = vmatpush3.bf16.msra.mxu1 %v2842_v39 }
 0xd41   :  { %2534 = vmatprep.subr.bf16.mxu1 %v2843_v31 }
 0xd44   :  { %2535 = vmatpush3.bf16.msra.mxu1 %v2844_v41 }
 0xd45   :  { %2536 = vmatprep.subr.bf16.mxu1 %v2845_v44 }
 0xd48   :  { %2537 = vmatpush3.bf16.msra.mxu1 %v2846_v28 }
 0xd49   :  { %2538 = vmatprep.subr.bf16.mxu1 %v2847_v45 }
 0xd4c   :  { %2539 = vmatpush3.bf16.msra.mxu1 %v2848_v46 }
 0xd4d   :  { %2540 = vmatprep.subr.bf16.mxu1 %v2849_v24 }
 0xd50   :  { %2541 = vmatpush3.bf16.msra.mxu1 %v2850_v48 }
 0xdb3   :  { %v1711_v14 = vpop.f32.mrb[36].mxu0 }
 0xdb4   :  { %v2648_v50 = vpop.f32.mrb[37].mxu0 }
 0xdb5   :  { %v1714_v36 = vpop.f32.mrb[38].mxu0 }
 0xdb6   :  { %v2649_v15 = vpop.f32.mrb[39].mxu0 }
 0xdbb   :  { %v1667_v52 = vpop.f32.mrb[28].mxu1 }
 0xdbc   :  { %v1712_v17 = vadd.f32 %v1711_v14, %v1667_v52  ;;  %v2636_v18 = vpop.f32.mrb[29].mxu1 }
 0xdbd   :  { %v1670_v16 = vpop.f32.mrb[30].mxu1 }
 0xdbe   :  { %v3769_v19 = vadd.f32 %v2981_v53, %v1712_v17  ;;  %v1715_v22 = vadd.f32 %v1714_v36, %v1670_v16  ;;  %v2637_v20 = vpop.f32.mrb[31].mxu1 }
 0xdc0   :  { %v3774_v26 = vadd.f32 %v2982_v21, %v1715_v22  ;;  %v1723_v23 = vmul.f32 %v3769_v19, %v3769_v19 }
 0xdc2   :  { %1729 = vadd.xlane.f32.xlu0 %v1723_v23  ;;  %v1724_v29 = vmul.f32 %v3774_v26, %v3774_v26 }
 0xdc4   :  { %1731 = vadd.xlane.f32.xlu1 %v1724_v29 }
 0xe05   :  { %v1987_v43 = vpop.f32.mrb[32].mxu1  ;;  %v2040_v49 = vpop.f32.mrb[40].mxu0 }
 0xe06   :  { %v2458_v25 = vmul.f32 -1.442695, %v1987_v43  ;;  %v1989_v59 = vpop.f32.mrb[33].mxu1  ;;  %v2042_v40 = vpop.f32.mrb[41].mxu0 }
 0xe07   :  { %v2459_v61 = vmul.f32 -1.442695, %v1989_v59  ;;  %v1991_v42 = vpop.f32.mrb[34].mxu1  ;;  %v2044_v62 = vpop.f32.mrb[42].mxu0 }
 0xe08   :  { %2943 = vpow2.f32 %v2458_v25  ;;  %v2460_v63 = vmul.f32 -1.442695, %v1991_v42  ;;  %v1993_v3 = vpop.f32.mrb[35].mxu1  ;;  %v2046_v9 = vpop.f32.mrb[43].mxu0 }
 0xe09   :  { %2945 = vpow2.f32 %v2459_v61  ;;  %v2461_v4 = vmul.f32 -1.442695, %v1993_v3 }
 0xe0a   :  { %2947 = vpow2.f32 %v2460_v63 }
 0xe0b   :  { %2949 = vpow2.f32 %v2461_v4 }
 0xe12   :  { %v2944_v6 = vpop.eup %2943 }
 0xe13   :  { %v2946_v7 = vpop.eup %2945  ;;  %v2083_v8 = vadd.f32 1.0, %v2944_v6 }
 0xe14   :  { %v2948_v55 = vpop.eup %2947  ;;  %v2084_v10 = vadd.f32 1.0, %v2946_v7 }
 0xe15   :  { %v2950_v0 = vpop.eup %2949  ;;  %2951 = vrcp.f32 %v2083_v8  ;;  %v2085_v11 = vadd.f32 1.0, %v2948_v55 }
 0xe16   :  { %2953 = vrcp.f32 %v2084_v10  ;;  %v2086_v2 = vadd.f32 1.0, %v2950_v0 }
 0xe17   :  { %2955 = vrcp.f32 %v2085_v11 }
 0xe18   :  { %2957 = vrcp.f32 %v2086_v2 }
 0xe1f   :  { %v2952_v5 = vpop.eup %2951 }
 0xe20   :  { %v2954_v30 = vpop.eup %2953  ;;  %v2107_v57 = vmul.f32 %v2952_v5, %v1987_v43 }
 0xe21   :  { %v2956_v27 = vpop.eup %2955  ;;  %v2108_v58 = vmul.f32 %v2954_v30, %v1989_v59 }
 0xe22   :  { %v2958_v38 = vpop.eup %2957  ;;  %v2115_v47 = vmul.f32 %v2107_v57, %v2040_v49  ;;  %v2109_v1 = vmul.f32 %v2956_v27, %v1991_v42 }
 0xe23   :  { %v2116_v12 = vmul.f32 %v2108_v58, %v2042_v40  ;;  %v2110_v13 = vmul.f32 %v2958_v38, %v1993_v3 }
 0xe24   :  { %v2117_v14 = vmul.f32 %v2109_v1, %v2044_v62 }
 0xe25   :  { %v2118_v50 = vmul.f32 %v2110_v13, %v2046_v9 }
 0xe26   :  { %v2123_v36 = vpack.c.bf16 %v2117_v14, %v2115_v47 }
 0xe27   :  { %v2124_v15 = vpack.c.bf16 %v2118_v50, %v2116_v12 }
 0xe4f   :  { %v1730_v52 = vpop.xlane.xlu0 %1729 }
 0xe50   :  { %v1735_v17 = vmul.f32 0.0078125, %v1730_v52 }
 0xe51   :  { %v1732_v18 = vpop.xlane.xlu1 %1731 }
 0xe52   :  { %v1739_v16 = vadd.f32 1e-06, %v1735_v17  ;;  %v1736_v53 = vmul.f32 0.0078125, %v1732_v18 }
 0xe54   :  { %2959 = vrsqrt.f32 %v1739_v16  ;;  %v1740_v22 = vadd.f32 1e-06, %v1736_v53 }
 0xe56   :  { %2961 = vrsqrt.f32 %v1740_v22 }
 0xe5e   :  { %v2960_v20 = vpop.eup %2959 }
 0xe5f   :  { %v1747_v21 = vmul.f32 %v2960_v20, %v3769_v19 }
 0xe60   :  { %v2962_v23 = vpop.eup %2961 }
 0xe61   :  { %v1748_v29 = vmul.f32 %v2962_v23, %v3774_v26  ;;  %v1757_v54 = vmul.f32 %v3756_v60, %v1747_v21 }
 0xe63   :  { %v1758_v32 = vmul.f32 %v3756_v60, %v1748_v29 }
 0xe65   :  { %v1760_v33 = vpack.c.bf16 %v1758_v32, %v1757_v54 }
 0xe67   :  { %1996 = vmatmul.mubr.bf16.gmra.mrb[36].mxu1 %v1760_v33  ;;  %2049 = vmatmul.mubr.bf16.gmra.mrb[44].mxu0 %v1760_v33 }
 0xe68   :  { %2287 = vmatprep.mubr.bf16.mxu1 %v2124_v15 }
 0xe6f   :  { %2288 = vmatmul.mubr.bf16.vlgmr.msra.gmra.mrb[40].mxu1 %v2123_v36 }
 0xf3a   :  { %v1997_v34 = vpop.f32.mrb[36].mxu1  ;;  %v2050_v35 = vpop.f32.mrb[44].mxu0 }
 0xf3b   :  { %v2462_v37 = vmul.f32 -1.442695, %v1997_v34  ;;  %v1999_v39 = vpop.f32.mrb[37].mxu1  ;;  %v2052_v31 = vpop.f32.mrb[45].mxu0 }
 0xf3c   :  { %v2463_v41 = vmul.f32 -1.442695, %v1999_v39  ;;  %v2001_v44 = vpop.f32.mrb[38].mxu1  ;;  %v2054_v28 = vpop.f32.mrb[46].mxu0 }
 0xf3d   :  { %2963 = vpow2.f32 %v2462_v37  ;;  %v2464_v45 = vmul.f32 -1.442695, %v2001_v44  ;;  %v2003_v46 = vpop.f32.mrb[39].mxu1  ;;  %v2056_v24 = vpop.f32.mrb[47].mxu0 }
 0xf3e   :  { %2965 = vpow2.f32 %v2463_v41  ;;  %v2465_v48 = vmul.f32 -1.442695, %v2003_v46 }
 0xf3f   :  { %2967 = vpow2.f32 %v2464_v45 }
 0xf40   :  { %2969 = vpow2.f32 %v2465_v48 }
 0xf42   :  { %v2542_v60 = vpop.f32.mrb[40].mxu1 }
 0xf43   :  { %v2543_v43 = vpop.f32.mrb[41].mxu1 }
 0xf44   :  { %v2544_v49 = vadd.f32 %v2543_v43, %v2542_v60  ;;  %v2545_v25 = vpop.f32.mrb[42].mxu1 }
 0xf45   :  { %v2546_v59 = vpop.f32.mrb[43].mxu1 }
 0xf46   :  { %v2304_v40 = vadd.f32 %v2544_v49, %v3642_v51  ;;  %v2547_v61 = vadd.f32 %v2546_v59, %v2545_v25 }
 0xf47   :  { %v2964_v42 = vpop.eup %2963 }
 0xf48   :  { %v2966_v62 = vpop.eup %2965  ;;  %v2087_v63 = vadd.f32 1.0, %v2964_v42  ;;  %2308 = vst [vmem:[#allocation2] sm:$0xff] %v2304_v40  ;;  %v2305_v3 = vadd.f32 %v2547_v61, %v3648_v56 }
 0xf49   :  { %v2968_v9 = vpop.eup %2967  ;;  %v2088_v4 = vadd.f32 1.0, %v2966_v62 }
 0xf4a   :  { %v2970_v6 = vpop.eup %2969  ;;  %2971 = vrcp.f32 %v2087_v63  ;;  %v2089_v7 = vadd.f32 1.0, %v2968_v9  ;;  %2309 = vst [vmem:[#allocation2 + $0x8] sm:$0xff] %v2305_v3 }
 0xf4b   :  { %2973 = vrcp.f32 %v2088_v4  ;;  %v2090_v8 = vadd.f32 1.0, %v2970_v6 }
 0xf4c   :  { %2975 = vrcp.f32 %v2089_v7 }
 0xf4d   :  { %2977 = vrcp.f32 %v2090_v8 }
 0xf54   :  { %v2972_v55 = vpop.eup %2971 }
 0xf55   :  { %v2974_v10 = vpop.eup %2973  ;;  %v2111_v51 = vmul.f32 %v2972_v55, %v1997_v34 }
 0xf56   :  { %v2976_v0 = vpop.eup %2975  ;;  %v2112_v11 = vmul.f32 %v2974_v10, %v1999_v39 }
 0xf57   :  { %v2978_v2 = vpop.eup %2977  ;;  %v2119_v5 = vmul.f32 %v2111_v51, %v2050_v35  ;;  %v2113_v30 = vmul.f32 %v2976_v0, %v2001_v44 }
 0xf58   :  { %v2120_v57 = vmul.f32 %v2112_v11, %v2052_v31  ;;  %v2114_v56 = vmul.f32 %v2978_v2, %v2003_v46 }
 0xf59   :  { %v2121_v27 = vmul.f32 %v2113_v30, %v2054_v28 }
 0xf5a   :  { %v2122_v58 = vmul.f32 %v2114_v56, %v2056_v24 }
 0xf5b   :  { %v2125_v38 = vpack.c.bf16 %v2121_v27, %v2119_v5 }
 0xf5c   :  { %v2126_v47 = vpack.c.bf16 %v2122_v58, %v2120_v57 }
 0xf5e   :  { %2295 = vmatprep.mubr.bf16.mxu1 %v2126_v47 }
 0xf5f   :  { %2296 = vmatmul.mubr.bf16.gmra.mrb[44].mxu1 %v2125_v38 }
0x1032   :  { %v2548_v1 = vpop.f32.mrb[44].mxu1 }
0x1033   :  { %v2549_v12 = vpop.f32.mrb[45].mxu1 }
0x1034   :  { %v2550_v13 = vadd.f32 %v2549_v12, %v2548_v1  ;;  %v2551_v14 = vpop.f32.mrb[46].mxu1 }
0x1035   :  { %v2552_v50 = vpop.f32.mrb[47].mxu1 }
0x1036   :  { %v2306_v36 = vadd.f32 %v2550_v13, %v3769_v19  ;;  %v2553_v15 = vadd.f32 %v2552_v50, %v2551_v14 }
0x1038   :  { %2310 = vst [vmem:[#allocation2 + $0x10] sm:$0xff] %v2306_v36  ;;  %v2307_v52 = vadd.f32 %v2553_v15, %v3774_v26 }
0x103a   :  { %2311 = vst [vmem:[#allocation2 + $0x18] sm:$0xff] %v2307_v52 }
0x103b   :  { %2994 = shalt.err (!%p2991_p4)
}
0x103c   :  { %s2995_s8 = scalar_lea.hbm %s3857_s12, 512 }
0x103d   :  { %p2996_p5 = scmp.ne.s32.totalorder %s3857_s12, %s2995_s8  ;;  %p2999_p6 = scmp.lt.u32.totalorder %s2995_s8, %s3857_s12 }
0x103f   :  { %p3001_p7 = pnand %p2999_p6, %p2996_p5 }
0x1041   :  { %3004 = shalt.err (!%p3001_p7)
}
0x1042   :  { %s3014_s1 = smov 128   ;;  %s3015_s16 = smov 8  }
0x1043   :  { %2323 = dma.vmem_to_hbm [thread:$0]  %s2318_s29, 512, %s3857_s12, [#allocation3], %s3014_s1, %s3014_s1, %s3015_s16  }
0x1044   :  { %3005 = dma.done.wait [#allocation3], 512  }
0x1045   :  { %3006 = vsyncadd [#allocation3], 4294966784 }
0x1046   :  { %2327 = vsyncpa [#allocation3], 1 }

</bundles_post_ra>
